<compile_context>
chip_gen: v6e
topology: v6e:2x2x1
jax: 0.10.0
libtpu: 0.0.40
codegen_flags: <defaults>
</compile_context>

<pallas_src>
import jax
import jax.numpy as jnp
from jax import lax
from jax.experimental import pallas as pl
from jax.experimental.pallas import tpu as pltpu

K = 10
D = 116 * 98  # 11368


def autoencoder_kernel(x_ref, w12t_ref, b12_ref, w3_ref, b3_ref, o_ref):
    # Folded encoder: h = x @ W12 + b12, with W12 stored transposed as (K, D).
    # Contract last dim of x (D) against last dim of W12^T (D) -> (TB, K).
    h = lax.dot_general(
        x_ref[...], w12t_ref[...],
        dimension_numbers=(((1,), (1,)), ((), ())),
        preferred_element_type=jnp.float32) + b12_ref[...]
    # Decoder: y = h @ W3 + b3, W3 is (K, D) (already lane-dense).
    y = jnp.dot(h, w3_ref[...],
                preferred_element_type=jnp.float32) + b3_ref[...]
    o_ref[...] = y.astype(o_ref.dtype)


def fold_encoder(params):
    """Exact offline fold of the two encoder Linears (no activation between)."""
    w1, b1, w2, b2, w3, b3 = params
    w12_t = jnp.transpose(w1 @ w2)      # (K, D): D on the lane axis
    b12 = b1 @ w2 + b2                  # (1, K)
    return w12_t, b12, w3, b3


def autoencoder_forward(x, params, *, batch_tile=128):
    """Forward pass of the Autoencoder.  x: (B, D) f32; params as init_params."""
    w12_t, b12, w3, b3 = fold_encoder(params)

    B = x.shape[0]
    TB = min(batch_tile, B)
    grid = (pl.cdiv(B, TB),)

    # VMEM budget: double-buffered x and out tiles + resident weights + slack.
    tile_bytes = TB * D * x.dtype.itemsize
    vmem_limit = min(2 * 2 * tile_bytes + (8 << 20), 48 << 20)

    return pl.pallas_call(
        autoencoder_kernel,
        out_shape=jax.ShapeDtypeStruct((B, D), x.dtype),
        grid=grid,
        in_specs=[
            pl.BlockSpec((TB, D), lambda i: (i, 0)),   # x: streamed per tile
            pl.BlockSpec((K, D), lambda i: (0, 0)),    # W12^T: VMEM-resident
            pl.BlockSpec((1, K), lambda i: (0, 0)),    # b12
            pl.BlockSpec((K, D), lambda i: (0, 0)),    # W3
            pl.BlockSpec((1, D), lambda i: (0, 0)),    # b3
        ],
        out_specs=pl.BlockSpec((TB, D), lambda i: (i, 0)),
        compiler_params=pltpu.CompilerParams(
            dimension_semantics=("parallel",),
            vmem_limit_bytes=int(vmem_limit),
        ),
    )(x, w12_t, b12, w3, b3)


def init_params(key):
    """Deterministic init mimicking nn.Linear's U(-1/sqrt(fan_in), 1/sqrt(fan_in)).

    Weights are stored as (in_features, out_features) so x @ W + b matches
    PyTorch's x @ W.T + b.
    """
    ks = jax.random.split(key, 6)

    def lin(kw, kb, fan_in, fan_out):
        bound = 1.0 / jnp.sqrt(jnp.float32(fan_in))
        w = jax.random.uniform(kw, (fan_in, fan_out), jnp.float32,
                               minval=-bound, maxval=bound)
        b = jax.random.uniform(kb, (1, fan_out), jnp.float32,
                               minval=-bound, maxval=bound)
        return w, b

    w1, b1 = lin(ks[0], ks[1], D, K)   # encoder Linear(116*98, K)
    w2, b2 = lin(ks[2], ks[3], K, K)   # encoder Linear(K, K)
    w3, b3 = lin(ks[4], ks[5], K, D)   # decoder Linear(K, 116*98)
    return (w1, b1, w2, b2, w3, b3)


def reference_forward(x, params):
    """Unfused 3-layer reference (matches the PyTorch module exactly)."""
    w1, b1, w2, b2, w3, b3 = params
    h = x @ w1 + b1
    h = h @ w2 + b2
    return h @ w3 + b3


if __name__ == "__main__":
    key = jax.random.PRNGKey(0)
    k_x, k_p = jax.random.split(key)

    # Feature dim is fixed by the module at 116*98; small batch, tiled so the
    # grid actually has >1 step (exercises pipelining / resident weights).
    B = 16
    x = jax.random.normal(k_x, (B, D), jnp.float32)
    params = init_params(k_p)

    out = autoencoder_forward(x, params, batch_tile=8)
    out = jax.block_until_ready(out)

    ref = reference_forward(x, params)
    assert out.shape == (B, D)
    assert jnp.allclose(out, ref, atol=1e-3, rtol=1e-3)

    print("KERNEL_OK")
</pallas_src>

<mosaic_0001>
module attributes {stable_mosaic.version = 11 : i64} {
  func.func @autoencoder_kernel(%arg0: i32, %arg1: memref<8x11368xf32, #tpu.memory_space<vmem>>, %arg2: memref<10x11368xf32, #tpu.memory_space<vmem>>, %arg3: memref<1x10xf32, #tpu.memory_space<vmem>>, %arg4: memref<10x11368xf32, #tpu.memory_space<vmem>>, %arg5: memref<1x11368xf32, #tpu.memory_space<vmem>>, %arg6: memref<8x11368xf32, #tpu.memory_space<vmem>>) attributes {dimension_semantics = [#tpu.dimension_semantics<parallel>], iteration_bounds = array<i64: 2>, scalar_prefetch = 0 : i64, scratch_operands = 0 : i64, tpu.core_type = #tpu.core_type<tc>, window_params = [{transform_indices = @transform_0, window_bounds = array<i64: 8, 11368>}, {pipeline_mode = #tpu.pipeline_mode<synchronous>, transform_indices = @transform_1, window_bounds = array<i64: 10, 11368>}, {pipeline_mode = #tpu.pipeline_mode<synchronous>, transform_indices = @transform_2, window_bounds = array<i64: 1, 10>}, {pipeline_mode = #tpu.pipeline_mode<synchronous>, transform_indices = @transform_3, window_bounds = array<i64: 10, 11368>}, {pipeline_mode = #tpu.pipeline_mode<synchronous>, transform_indices = @transform_4, window_bounds = array<i64: 1, 11368>}, {transform_indices = @transform_5, window_bounds = array<i64: 8, 11368>}]} {
    %c0 = arith.constant 0 : index
    %c0_0 = arith.constant 0 : index
    %0 = vector.load %arg1[%c0, %c0_0] : memref<8x11368xf32, #tpu.memory_space<vmem>>, vector<8x11368xf32>
    %c0_1 = arith.constant 0 : index
    %c0_2 = arith.constant 0 : index
    %1 = vector.load %arg2[%c0_1, %c0_2] : memref<10x11368xf32, #tpu.memory_space<vmem>>, vector<10x11368xf32>
    %cst = arith.constant dense<0.000000e+00> : vector<8x10xf32>
    %2 = tpu.matmul %0, %1, %cst {dimension_numbers = #tpu.dot_dimension_numbers<[1], [1], [0], [0], [0, 0, 1, 0], [], []>} : vector<8x11368xf32>, vector<10x11368xf32>, vector<8x10xf32> -> vector<8x10xf32>
    %c0_3 = arith.constant 0 : index
    %c0_4 = arith.constant 0 : index
    %3 = vector.load %arg3[%c0_3, %c0_4] : memref<1x10xf32, #tpu.memory_space<vmem>>, vector<1x10xf32>
    %4 = vector.broadcast %3 : vector<1x10xf32> to vector<8x10xf32>
    %5 = arith.addf %2, %4 : vector<8x10xf32>
    %c0_5 = arith.constant 0 : index
    %c0_6 = arith.constant 0 : index
    %6 = vector.load %arg4[%c0_5, %c0_6] : memref<10x11368xf32, #tpu.memory_space<vmem>>, vector<10x11368xf32>
    %cst_7 = arith.constant dense<0.000000e+00> : vector<8x11368xf32>
    %7 = tpu.matmul %5, %6, %cst_7 {dimension_numbers = #tpu.dot_dimension_numbers<[1], [0], [0], [1], [0, 0, 1, 1], [], []>} : vector<8x10xf32>, vector<10x11368xf32>, vector<8x11368xf32> -> vector<8x11368xf32>
    %c0_8 = arith.constant 0 : index
    %c0_9 = arith.constant 0 : index
    %8 = vector.load %arg5[%c0_8, %c0_9] : memref<1x11368xf32, #tpu.memory_space<vmem>>, vector<1x11368xf32>
    %9 = vector.broadcast %8 : vector<1x11368xf32> to vector<8x11368xf32>
    %10 = arith.addf %7, %9 : vector<8x11368xf32>
    %c0_10 = arith.constant 0 : index
    %c0_11 = arith.constant 0 : index
    %11 = vector.load %arg6[%c0_10, %c0_11] : memref<8x11368xf32, #tpu.memory_space<vmem>>, vector<8x11368xf32>
    tpu.vector_store %arg6[%c0_10, %c0_11], %10 {strides = array<i32>} : memref<8x11368xf32, #tpu.memory_space<vmem>>, vector<8x11368xf32>,
    return
  }
  func.func @transform_0(%arg0: i32) -> (i32, i32) {
    %c0_i32 = arith.constant 0 : i32
    %c0_i32_0 = arith.constant 0 : i32
    return %arg0, %c0_i32 : i32, i32
  }
  func.func @transform_1(%arg0: i32) -> (i32, i32) {
    %c0_i32 = arith.constant 0 : i32
    %c0_i32_0 = arith.constant 0 : i32
    %c0_i32_1 = arith.constant 0 : i32
    return %c0_i32, %c0_i32_0 : i32, i32
  }
  func.func @transform_2(%arg0: i32) -> (i32, i32) {
    %c0_i32 = arith.constant 0 : i32
    %c0_i32_0 = arith.constant 0 : i32
    %c0_i32_1 = arith.constant 0 : i32
    return %c0_i32, %c0_i32_0 : i32, i32
  }
  func.func @transform_3(%arg0: i32) -> (i32, i32) {
    %c0_i32 = arith.constant 0 : i32
    %c0_i32_0 = arith.constant 0 : i32
    %c0_i32_1 = arith.constant 0 : i32
    return %c0_i32, %c0_i32_0 : i32, i32
  }
  func.func @transform_4(%arg0: i32) -> (i32, i32) {
    %c0_i32 = arith.constant 0 : i32
    %c0_i32_0 = arith.constant 0 : i32
    %c0_i32_1 = arith.constant 0 : i32
    return %c0_i32, %c0_i32_0 : i32, i32
  }
  func.func @transform_5(%arg0: i32) -> (i32, i32) {
    %c0_i32 = arith.constant 0 : i32
    %c0_i32_0 = arith.constant 0 : i32
    return %arg0, %c0_i32 : i32, i32
  }
}

</mosaic_0001>

<bundles_post_ra>
// kernel: tpu_custom_call.1
= control target key start
LH: loop header
LB: loop body
LE: loop exit
PB: predicated region body
PF: predicated region fallthrough
CT: control target
= control target key end

     0   :  { %10 = vsyncpa [#allocation3], 0  ;;  %s9318_s0 = inlined_call_operand.hbm [shape: f32[16,11368], index: 0, kind: input, shape index: {}]   ;;  %s9319_s1 = inlined_call_operand.hbm [shape: f32[10,11368], index: 1, kind: input, shape index: {}]   ;;  %s9320_s2 = inlined_call_operand.vmem [shape: f32[1,10], index: 2, kind: input, shape index: {}]   ;;  %s9321_s3 = inlined_call_operand.hbm [shape: f32[10,11368], index: 3, kind: input, shape index: {}]   ;;  %s9322_s4 = inlined_call_operand.hbm [shape: f32[1,11368], index: 4, kind: input, shape index: {}]   ;;  %s9323_s5 = inlined_call_operand.hbm [shape: f32[16,11368], index: 5, kind: output, shape index: {}]  }
   0x1   :  { %12 = vsyncpa [#allocation3 + $0x1], 0 }
   0x2   :  { %13 = vsyncpa [#allocation6], 0 }
   0x3   :  { %14 = vsyncpa [#allocation9], 0 }
   0x4   :  { %15 = vsyncpa [#allocation4], 0 }
   0x5   :  { %17 = vsyncpa [#allocation4 + $0x1], 0  ;;  %s8510_s18 = smov 0   ;;  %s8512_s19 = smov 0  }
   0x6   :  { %s8514_s20 = smov 0   ;;  %s8516_s21 = smov 0  }
   0x7 LB: > { %s8531_s22 = sadd.s32 4294967295, %s8469_s21   ;;  %s8033_s23 = sadd.s32 4294967294, %s8469_s21   ;;  %s8469_s21 = sphi %s8516_s21, %s9347_s21   ;;  %s8465_s20 = sphi %s8514_s20, %s9346_s20   ;;  %s8461_s19 = sphi %s8512_s19, %s9345_s19   ;;  %s8457_s18 = sphi %s8510_s18, %s9344_s18  }
   0x8   : > { %p43_p0 = scmp.ne.s32.totalorder %s8461_s19, %s8457_s18  ;;  %p9324_p1 = scmp.eq.s32.totalorder %s8531_s22, 0 }
   0x9   : > { %p157_p3 = scmp.eq.s32.totalorder %s8033_s23, 1  ;;  %p8034_p5 = scmp.ge.s32.totalorder %s8469_s21, 1 }
   0xa   : > { %p8540_p4 = por %p9324_p1, %p43_p0  ;;  %p164_p7 = scmp.lt.s32.totalorder %s8469_s21, 3 }
   0xb   : > { %p8545_p6 = por %p157_p3, %p43_p0  ;;  %s8471_s27 = smov [#allocation5]  }
   0xc   : > { %s9328_s24 = scalar_select %p8540_p4, 1, 0 }
   0xd   : > { %s9329_s25 = scalar_select %p8545_p6, 1, 0 }
   0xe   : > { %p8550_p8 = pnand %p8034_p5, %p164_p7  ;;  %s176_s28 = sshll.u32 %s8471_s27, 4  ;;  %s177_s28 = int_to_ptr.vmem [resolvable:$true] %s176_s28 }
   0xf   : > { %s8472_s30 = smov [#allocation7]   ;;  %s8473_s7 = smov [#allocation8]  }
  0x10   : > { %s9330_s26 = scalar_select %p8550_p8, 1, 0 }
  0x11   : > { %p8226_p9 = pneg %p8550_p8  ;;  %s192_s6 = sshll.u32 %s8472_s30, 4  ;;  %s193_s6 = int_to_ptr.vmem [resolvable:$true] %s192_s6 }
  0x12   : > { %s206_s8 = sshll.u32 %s8473_s7, 4  ;;  %s8302_s9 = scalar_lea.vmem %s177_s28, 22784  ;;  %s207_s8 = int_to_ptr.vmem [resolvable:$true] %s206_s8 }
  0x13   : > { %p8559_p11 = pnand %p8226_p9, %p9324_p1  ;;  %p8303_p13 = scmp.ne.s32.totalorder %s177_s28, %s8302_s9 }
  0x14   : > { %p8310_p5 = scmp.lt.s32.totalorder %s177_s28, %s177_s28  ;;  %p8311_p7 = scmp.lt.s32.totalorder %s8302_s9, %s8302_s9 }
  0x15   : > { %p8293_p12 = pneg %p8559_p11 }
  0x16   : > { %p8312_p9 = por %p8311_p7, %p8310_p5 }
  0x17   : > { %p8305_p0 = pnand %p8303_p13, %p8293_p12 }
  0x19   : > { %p8306_p3 = pneg %p8305_p0 }
  0x1b   : > { %p8313_p10 = pnand %p8312_p9, %p8306_p3 }
  0x1d   : > { %8316 = shalt.err (!%p8313_p10)
}
  0x1e   : > { %s8474_s10 = smov 11392   ;;  %s8475_s11 = smov 712  }
  0x1f   : > { %8229 = dma.hbm_to_vmem [thread:$0]  (!%p8559_p11), %s9319_s1, 22784, %s177_s28, [#allocation6], %s8474_s10, %s8474_s10, %s8475_s11  }
  0x20   : > { %s8328_s14 = scalar_lea.vmem %s193_s6, 22784  ;;  %p8336_p2 = scmp.lt.s32.totalorder %s193_s6, %s193_s6 }
  0x21   : > { %p8329_p1 = scmp.ne.s32.totalorder %s193_s6, %s8328_s14  ;;  %p8337_p6 = scmp.lt.s32.totalorder %s8328_s14, %s8328_s14 }
  0x23   : > { %p8331_p13 = pnand %p8329_p1, %p8293_p12  ;;  %p8338_p5 = por %p8337_p6, %p8336_p2 }
  0x25   : > { %p8332_p0 = pneg %p8331_p13 }
  0x27   : > { %p8339_p3 = pnand %p8338_p5, %p8332_p0 }
  0x29   : > { %8342 = shalt.err (!%p8339_p3)
}
  0x2a   : > { %8232 = dma.hbm_to_vmem [thread:$0]  (!%p8559_p11), %s9321_s3, 22784, %s193_s6, [#allocation6], %s8474_s10, %s8474_s10, %s8475_s11  }
  0x2b   : > { %s8354_s17 = scalar_lea.vmem %s207_s8, 1424  ;;  %s8361_s23 = scalar_lea.vmem %s207_s8, 1440 }
  0x2c   : > { %p8355_p10 = scmp.ne.s32.totalorder %s207_s8, %s8354_s17  ;;  %p8362_p9 = scmp.lt.s32.totalorder %s207_s8, %s207_s8 }
  0x2d   : > { %p8363_p13 = scmp.lt.s32.totalorder %s8361_s23, %s8354_s17 }
  0x2e   : > { %p8357_p7 = pnand %p8355_p10, %p8293_p12 }
  0x2f   : > { %p8364_p2 = por %p8363_p13, %p8362_p9 }
  0x30   : > { %p8358_p1 = pneg %p8357_p7 }
  0x32   : > { %p8365_p6 = pnand %p8364_p2, %p8358_p1 }
  0x34   : > { %8368 = shalt.err (!%p8365_p6)
}
  0x35   : > { %8235 = dma.hbm_to_vmem [thread:$0]  (!%p8559_p11), %s9322_s4, 1424, %s207_s8, [#allocation9]  }
  0x36   : > { %s8590_s30 = sadd.s32 1, %s8469_s21   ;;  %s30_s29 = sadd.s32 1, %s8465_s20 }
  0x37   : > { %s27_s6 = ssub.s32 %s8469_s21, %s8590_s30  ;;  %p37_p0 = scmp.ne.s32.totalorder %s8465_s20, %s8461_s19 }
  0x38   : > { %p28_p12 = scmp.eq.s32.totalorder %s27_s6, 0  ;;  %p38_p5 = scmp.eq.s32.totalorder %s8469_s21, 0 }
  0x39   : > { %p8247_p3 = scmp.lt.s32.totalorder %s8469_s21, 2  ;;  %p9332_p7 = scmp.eq.s32.totalorder %s8531_s22, 1 }
  0x3a   : > { %s8600_s7 = scalar_select %p28_p12, %s8465_s20, %s30_s29  }
  0x3b   : > { %p39_p10 = por %p38_p5, %p37_p0  ;;  %p8604_p1 = por %p9332_p7, %p37_p0 }
  0x3c   : > { %s217_s10 = sand.u32 1, %s8465_s20   ;;  %s8207_s11 = smul.u32 11392, %s8469_s21 }
  0x3d   : > { %s9333_s9 = scalar_select %p8604_p1, 1, 0 }
  0x3e   : > { %s8206_s8 = smul.u32 712, %s217_s10  ;;  %p8610_p11 = pnand %p8247_p3, %p39_p10 }
  0x3f   : > { %s8617_s15 = scalar_lea.hbm %s9318_s0, %s8207_s11  ;;  %s218_s23 = scalar_lea.sflag [#allocation3], %s217_s10 }
  0x40   : > { %s221_s16 = scalar_lea.vmem [#allocation2], %s8206_s8  ;;  %s8369_s27 = scalar_lea.hbm %s8617_s15, 11392 }
  0x41   : > { %s229_s17 = sshll.u32 %s221_s16, 4  ;;  %p8370_p9 = scmp.ne.s32.totalorder %s8617_s15, %s8369_s27  ;;  %s230_s17 = int_to_ptr.vmem [resolvable:$true] %s229_s17 }
  0x42   : > { %p8371_p13 = pneg %p8610_p11  ;;  %s8374_s29 = scalar_lea.hbm %s9318_s0, 22784 }
  0x43   : > { %p8375_p12 = scmp.lt.s32.totalorder %s8617_s15, %s9318_s0  ;;  %p8376_p0 = scmp.lt.s32.totalorder %s8374_s29, %s8369_s27 }
  0x44   : > { %p8372_p2 = pnand %p8371_p13, %p8370_p9 }
  0x45   : > { %p8377_p5 = por %p8376_p0, %p8375_p12 }
  0x46   : > { %p8373_p6 = pneg %p8372_p2 }
  0x48   : > { %p8378_p3 = pnand %p8377_p5, %p8373_p6 }
  0x4a   : > { %8381 = shalt.err (!%p8378_p3)
}
  0x4b   : > { %s8382_s8 = scalar_lea.vmem %s230_s17, 11392  ;;  %s8476_s10 = smov [#allocation2]  }
  0x4c   : > { %p8383_p10 = scmp.ne.s32.totalorder %s230_s17, %s8382_s8  ;;  %s8387_s14 = sshll.u32 %s8476_s10, 4  ;;  %s8388_s14 = int_to_ptr.vmem [resolvable:$false] %s8387_s14 }
  0x4d   : > { %s8389_s16 = scalar_lea.vmem %s8388_s14, 22784  ;;  %p8390_p9 = scmp.lt.s32.totalorder %s230_s17, %s8388_s14 }
  0x4e   : > { %p8385_p7 = pnand %p8383_p10, %p8371_p13  ;;  %p8391_p2 = scmp.lt.s32.totalorder %s8389_s16, %s8382_s8 }
  0x50   : > { %p8386_p1 = pneg %p8385_p7  ;;  %p8392_p4 = por %p8391_p2, %p8390_p9 }
  0x52   : > { %p8393_p8 = pnand %p8392_p4, %p8386_p1 }
  0x54   : > { %8396 = shalt.err (!%p8393_p8)
}
  0x55   : > { %8239 = dma.hbm_to_vmem [thread:$0]  (!%p8610_p11), %s8617_s15, 11392, %s230_s17, %s218_s23  }
  0x56   : > { %p9335_p6 = scmp.ne.s32.totalorder %s9330_s26, 0 }
  0x57   : > { %s8636_s27 = sand.u32 (!%p9335_p6), 1, %s8461_s19   ;;  %p9336_p4 = scmp.ne.s32.totalorder (!%p9335_p6), %s9328_s24, 0 }
  0x58   : > { %238 = sbr.rel (%p9335_p6) target bundleno = 820 (0x334), region = 40  ;;  %s241_s6 = scalar_lea.sflag (!%p9335_p6), [#allocation3], %s8636_s27 }
  0x59   : > { %s8208_s28 = smul.u32 (!%p9335_p6), 712, %s8636_s27 }
  0x5b   : > { %s8642_s29 = scalar_lea.vmem (!%p9335_p6), [#allocation2], %s8208_s28 }
  0x5d   : > { %8440 = dma.done.wait (%p9336_p4), %s241_s6, 11392  }
  0x5e   : > { %8442 = vsyncadd (%p9336_p4), %s241_s6, 4294955904  ;;  %p9337_p8 = scmp.eq.s32.totalorder %s8531_s22, 0 }
  0x60   : > { %8444 = dma.done.wait (%p9337_p8), [#allocation6], 45568   ;;  %p9338_p1 = pmov %p9337_p8 }
  0x62   : > { %8446 = vsyncadd (%p9338_p1), [#allocation6], 4294921728  ;;  %p9339_p11 = pmov %p9338_p1 }
  0x63   : > { %p9340_p13 = pmov %p9338_p1 }
  0x64   : > { %8448 = dma.done.wait (%p9339_p11), [#allocation9], 1424  }
  0x65   : > { %8450 = vsyncadd (%p9340_p13), [#allocation9], 4294965872  ;;  %v462_v0 = vld [vmem:[#allocation5 + $0x2d0] sm:$0x3]  ;;  %v461_v1 = vld [vmem:[#allocation5 + $0x2c8] sm:$0x3] }
  0x66   : > { %v464_v2 = vld [vmem:[#allocation5 + $0x2e0] sm:$0x3]  ;;  %595 = vmatprep.subr.mxu0 %v462_v0  ;;  %v463_v3 = vld [vmem:[#allocation5 + $0x2d8] sm:$0x3]  ;;  %v373_v4 = vld [vmem:[#allocation5 + $0x8] sm:$0xff]  ;;  %vm557_vm0 = vcmask 850944  }
  0x67   : > { %665 = vmatprep.subr.mxu1 %v464_v2  ;;  %596 = vmatpush1.xpose.msra.mxu0 %v461_v1  ;;  %v375_v5 = vld [vmem:[#allocation5 + $0x18] sm:$0xff]  ;;  %v372_v7 = vld [vmem:[#allocation5] sm:$0xff]  ;;  %v374_v8 = vld [vmem:[#allocation5 + $0x10] sm:$0xff]  ;;  %vm8478_vm1 = vmmov 0   ;;  %vm4368_vm2 = vcmask 1041408   ;;  %vm4364_vm3 = vcmask 80896  }
  0x68   : > { %666 = vmatpush1.xpose.msra.mxu1 %v463_v3  ;;  %v284_v6 = vld [vmem:[%s8642_s29 + $0x8] sm:$0xff]  ;;  %597 = vmatprep.subr.mxu0 %v373_v4  ;;  %v466_v9 = vld [vmem:[#allocation5 + $0x2f0] sm:$0x3]  ;;  %v285_v13 = vld [vmem:[%s8642_s29 + $0x10] sm:$0xff]  ;;  %s9005_s12 = scalar_lea.vmem [#allocation10], %s8208_s28  ;;  %s8209_s15 = smul.u32 11392, %s8531_s22 }
  0x69   : > { %667 = vmatprep.subr.mxu1 %v375_v5  ;;  %631 = vmatprep.mubr.f32.mxu0 %v284_v6  ;;  %v286_v10 = vld [vmem:[%s8642_s29 + $0x18] sm:$0xff]  ;;  %v468_v11 = vld [vmem:[#allocation5 + $0x300] sm:$0x3]  ;;  %v283_v12 = vld [vmem:[%s8642_s29] sm:$0xff]  ;;  %s7934_s17 = sshll.u32 %s9005_s12, 4  ;;  %s7920_s8 = scalar_lea.sflag [#allocation4], %s8636_s27  ;;  %s7935_s17 = int_to_ptr.vmem [resolvable:$true] %s7934_s17 }
  0x6a   : > { %701 = vmatprep.mubr.f32.mxu1 %v286_v10  ;;  %v465_v14 = vld [vmem:[#allocation5 + $0x2e8] sm:$0x3]  ;;  %v467_v15 = vld [vmem:[#allocation5 + $0x2f8] sm:$0x3]  ;;  %v376_v20 = vld [vmem:[#allocation5 + $0x20] sm:$0xff]  ;;  %s7932_s11 = scalar_lea.hbm %s9323_s5, %s8209_s15  ;;  %s8397_s10 = scalar_lea.vmem %s7935_s17, 11392 }
  0x6b   : > { %598 = vmatpush1.xpose.msra.mxu0 %v372_v7  ;;  %v377_v16 = vld [vmem:[#allocation5 + $0x28] sm:$0xff]  ;;  %v379_v17 = vld [vmem:[#allocation5 + $0x38] sm:$0xff]  ;;  %v378_v21 = vld [vmem:[#allocation5 + $0x30] sm:$0xff]  ;;  %p8398_p12 = scmp.ne.s32.totalorder %s7935_s17, %s8397_s10  ;;  %p9341_p0 = scmp.ne.s32.totalorder %s9333_s9, 0 }
  0x6c   : > { %668 = vmatpush1.xpose.msra.mxu1 %v374_v8  ;;  %735 = vmatprep.subr.mxu0 %v466_v9  ;;  %v288_v18 = vld [vmem:[%s8642_s29 + $0x28] sm:$0xff]  ;;  %v290_v19 = vld [vmem:[%s8642_s29 + $0x38] sm:$0xff]  ;;  %v287_v24 = vld [vmem:[%s8642_s29 + $0x20] sm:$0xff]  ;;  %s8479_s22 = smov [#allocation10]  }
  0x6d   : > { %805 = vmatprep.subr.mxu1 %v468_v11  ;;  %v470_v22 = vld [vmem:[#allocation5 + $0x310] sm:$0x3]  ;;  %v472_v23 = vld [vmem:[#allocation5 + $0x320] sm:$0x3]  ;;  %v469_v26 = vld [vmem:[#allocation5 + $0x308] sm:$0x3]  ;;  %p8399_p5 = pnand %p8398_p12, %p9341_p0 }
  0x6e   : > { %632 = vmatmul.mubr.f32.vlgmr.msra.gmra.mxu0 %v283_v12  ;;  %v289_v25 = vld [vmem:[%s8642_s29 + $0x30] sm:$0xff]  ;;  %v471_v27 = vld [vmem:[#allocation5 + $0x318] sm:$0x3]  ;;  %v294_v31 = vld [vmem:[%s8642_s29 + $0x58] sm:$0xff]  ;;  %s8401_s14 = sshll.u32 %s8479_s22, 4  ;;  %s8402_s14 = int_to_ptr.vmem [resolvable:$false] %s8401_s14 }
  0x6f   : > { %702 = vmatmul.mubr.f32.vlgmr.msra.gmra.mxu1 %v285_v13  ;;  %736 = vmatpush1.xpose.msra.mxu0 %v465_v14  ;;  %v381_v28 = vld [vmem:[#allocation5 + $0x48] sm:$0xff]  ;;  %v383_v29 = vld [vmem:[#allocation5 + $0x58] sm:$0xff]  ;;  %v380_v32 = vld [vmem:[#allocation5 + $0x40] sm:$0xff]  ;;  %p8400_p3 = pneg %p8399_p5  ;;  %s8403_s16 = scalar_lea.vmem %s8402_s14, 22784 }
  0x70   : > { %806 = vmatpush1.xpose.msra.mxu1 %v467_v15  ;;  %737 = vmatprep.subr.mxu0 %v377_v16  ;;  %v292_v30 = vld [vmem:[%s8642_s29 + $0x48] sm:$0xff]  ;;  %v382_v33 = vld [vmem:[#allocation5 + $0x50] sm:$0xff]  ;;  %v293_v37 = vld [vmem:[%s8642_s29 + $0x50] sm:$0xff]  ;;  %p8404_p10 = scmp.lt.s32.totalorder %s7935_s17, %s8402_s14  ;;  %p8405_p7 = scmp.lt.s32.totalorder %s8403_s16, %s8397_s10 }
  0x71   : > { %807 = vmatprep.subr.mxu1 %v379_v17  ;;  %771 = vmatprep.mubr.f32.mxu0 %v288_v18  ;;  %v474_v34 = vld [vmem:[#allocation5 + $0x330] sm:$0x3]  ;;  %v476_v35 = vld [vmem:[#allocation5 + $0x340] sm:$0x3]  ;;  %v473_v38 = vld [vmem:[#allocation5 + $0x328] sm:$0x3] }
  0x72   : > { %841 = vmatprep.mubr.f32.mxu1 %v290_v19  ;;  %v291_v36 = vld [vmem:[%s8642_s29 + $0x40] sm:$0xff]  ;;  %v385_v40 = vld [vmem:[#allocation5 + $0x68] sm:$0xff]  ;;  %v296_v42 = vld [vmem:[%s8642_s29 + $0x68] sm:$0xff]  ;;  %p8406_p9 = por %p8405_p7, %p8404_p10 }
  0x73   : > { %738 = vmatpush1.xpose.msra.mxu0 %v376_v20  ;;  %v475_v39 = vld [vmem:[#allocation5 + $0x338] sm:$0x3]  ;;  %v298_v43 = vld [vmem:[%s8642_s29 + $0x78] sm:$0xff]  ;;  %v384_v44 = vld [vmem:[#allocation5 + $0x60] sm:$0xff] }
  0x74   : > { %808 = vmatpush1.xpose.msra.mxu1 %v378_v21  ;;  %875 = vmatprep.subr.mxu0 %v470_v22  ;;  %v387_v41 = vld [vmem:[#allocation5 + $0x78] sm:$0xff]  ;;  %v386_v45 = vld [vmem:[#allocation5 + $0x70] sm:$0xff]  ;;  %v480_v47 = vld [vmem:[#allocation5 + $0x360] sm:$0x3]  ;;  %p8407_p2 = pnand %p8406_p9, %p8400_p3 }
  0x75   : > { %945 = vmatprep.subr.mxu1 %v472_v23  ;;  %v478_v46 = vld [vmem:[#allocation5 + $0x350] sm:$0x3]  ;;  %v297_v49 = vld [vmem:[%s8642_s29 + $0x70] sm:$0xff]  ;;  %v479_v51 = vld [vmem:[#allocation5 + $0x358] sm:$0x3] }
  0x76   : > { %772 = vmatmul.mubr.f32.vlgmr.msra.gmra.mxu0 %v287_v24  ;;  %v295_v48 = vld [vmem:[%s8642_s29 + $0x60] sm:$0xff]  ;;  %v477_v50 = vld [vmem:[#allocation5 + $0x348] sm:$0x3]  ;;  %v300_v54 = vld [vmem:[%s8642_s29 + $0x88] sm:$0xff] }
  0x77   : > { %842 = vmatmul.mubr.f32.vlgmr.msra.gmra.mxu1 %v289_v25  ;;  %876 = vmatpush1.xpose.msra.mxu0 %v469_v26  ;;  %v389_v52 = vld [vmem:[#allocation5 + $0x88] sm:$0xff]  ;;  %v391_v53 = vld [vmem:[#allocation5 + $0x98] sm:$0xff]  ;;  %v388_v56 = vld [vmem:[#allocation5 + $0x80] sm:$0xff] }
  0x78   : > { %946 = vmatpush1.xpose.msra.mxu1 %v471_v27  ;;  %877 = vmatprep.subr.mxu0 %v381_v28  ;;  %v302_v55 = vld [vmem:[%s8642_s29 + $0x98] sm:$0xff]  ;;  %v484_v59 = vld [vmem:[#allocation5 + $0x380] sm:$0x3]  ;;  %v299_v60 = vld [vmem:[%s8642_s29 + $0x80] sm:$0xff] }
  0x79   : > { %947 = vmatprep.subr.mxu1 %v383_v29  ;;  %911 = vmatprep.mubr.f32.mxu0 %v292_v30  ;;  %v390_v57 = vld [vmem:[#allocation5 + $0x90] sm:$0xff]  ;;  %v301_v61 = vld [vmem:[%s8642_s29 + $0x90] sm:$0xff]  ;;  %v483_v63 = vld [vmem:[#allocation5 + $0x378] sm:$0x3] }
  0x7a   : > { %981 = vmatprep.mubr.f32.mxu1 %v294_v31  ;;  %v482_v58 = vld [vmem:[#allocation5 + $0x370] sm:$0x3]  ;;  %v481_v62 = vld [vmem:[#allocation5 + $0x368] sm:$0x3]  ;;  %v395_v1 = vld [vmem:[#allocation5 + $0xb8] sm:$0xff] }
  0x7b   : > { %878 = vmatpush1.xpose.msra.mxu0 %v380_v32  ;;  %v393_v0 = vld [vmem:[#allocation5 + $0xa8] sm:$0xff]  ;;  %v304_v2 = vld [vmem:[%s8642_s29 + $0xa8] sm:$0xff]  ;;  %v394_v5 = vld [vmem:[#allocation5 + $0xb0] sm:$0xff] }
  0x7c   : > { %948 = vmatpush1.xpose.msra.mxu1 %v382_v33  ;;  %1015 = vmatprep.subr.mxu0 %v474_v34  ;;  %v306_v3 = vld [vmem:[%s8642_s29 + $0xb8] sm:$0xff]  ;;  %v392_v4 = vld [vmem:[#allocation5 + $0xa0] sm:$0xff]  ;;  %v303_v8 = vld [vmem:[%s8642_s29 + $0xa0] sm:$0xff] }
  0x7d   : > { %1085 = vmatprep.subr.mxu1 %v476_v35  ;;  %v486_v6 = vld [vmem:[#allocation5 + $0x390] sm:$0x3]  ;;  %v488_v7 = vld [vmem:[#allocation5 + $0x3a0] sm:$0x3]  ;;  %v485_v10 = vld [vmem:[#allocation5 + $0x388] sm:$0x3] }
  0x7e   : > { %912 = vmatmul.mubr.f32.vlgmr.msra.gmra.mxu0 %v291_v36  ;;  %v305_v9 = vld [vmem:[%s8642_s29 + $0xb0] sm:$0xff]  ;;  %v487_v11 = vld [vmem:[#allocation5 + $0x398] sm:$0x3]  ;;  %v310_v15 = vld [vmem:[%s8642_s29 + $0xd8] sm:$0xff] }
  0x7f   : > { %982 = vmatmul.mubr.f32.vlgmr.msra.gmra.mxu1 %v293_v37  ;;  %1016 = vmatpush1.xpose.msra.mxu0 %v473_v38  ;;  %v397_v12 = vld [vmem:[#allocation5 + $0xc8] sm:$0xff]  ;;  %v399_v13 = vld [vmem:[#allocation5 + $0xd8] sm:$0xff]  ;;  %v396_v16 = vld [vmem:[#allocation5 + $0xc0] sm:$0xff] }
  0x80   : > { %1086 = vmatpush1.xpose.msra.mxu1 %v475_v39  ;;  %1017 = vmatprep.subr.mxu0 %v385_v40  ;;  %v308_v14 = vld [vmem:[%s8642_s29 + $0xc8] sm:$0xff]  ;;  %v398_v17 = vld [vmem:[#allocation5 + $0xd0] sm:$0xff]  ;;  %v309_v21 = vld [vmem:[%s8642_s29 + $0xd0] sm:$0xff] }
  0x81   : > { %1087 = vmatprep.subr.mxu1 %v387_v41  ;;  %1051 = vmatprep.mubr.f32.mxu0 %v296_v42  ;;  %v490_v18 = vld [vmem:[#allocation5 + $0x3b0] sm:$0x3]  ;;  %v492_v19 = vld [vmem:[#allocation5 + $0x3c0] sm:$0x3]  ;;  %v489_v22 = vld [vmem:[#allocation5 + $0x3a8] sm:$0x3] }
  0x82   : > { %1121 = vmatprep.mubr.f32.mxu1 %v298_v43  ;;  %v307_v20 = vld [vmem:[%s8642_s29 + $0xc0] sm:$0xff]  ;;  %v401_v24 = vld [vmem:[#allocation5 + $0xe8] sm:$0xff]  ;;  %v312_v26 = vld [vmem:[%s8642_s29 + $0xe8] sm:$0xff] }
  0x83   : > { %1018 = vmatpush1.xpose.msra.mxu0 %v384_v44  ;;  %v491_v23 = vld [vmem:[#allocation5 + $0x3b8] sm:$0x3]  ;;  %v314_v27 = vld [vmem:[%s8642_s29 + $0xf8] sm:$0xff]  ;;  %v400_v28 = vld [vmem:[#allocation5 + $0xe0] sm:$0xff] }
  0x84   : > { %1088 = vmatpush1.xpose.msra.mxu1 %v386_v45  ;;  %1155 = vmatprep.subr.mxu0 %v478_v46  ;;  %v403_v25 = vld [vmem:[#allocation5 + $0xf8] sm:$0xff]  ;;  %v402_v29 = vld [vmem:[#allocation5 + $0xf0] sm:$0xff]  ;;  %v496_v31 = vld [vmem:[#allocation5 + $0x3e0] sm:$0x3] }
  0x85   : > { %1225 = vmatprep.subr.mxu1 %v480_v47  ;;  %v494_v30 = vld [vmem:[#allocation5 + $0x3d0] sm:$0x3]  ;;  %v313_v33 = vld [vmem:[%s8642_s29 + $0xf0] sm:$0xff]  ;;  %v495_v35 = vld [vmem:[#allocation5 + $0x3d8] sm:$0x3] }
  0x86   : > { %1052 = vmatmul.mubr.f32.vlgmr.msra.gmra.mxu0 %v295_v48  ;;  %v311_v32 = vld [vmem:[%s8642_s29 + $0xe0] sm:$0xff]  ;;  %v493_v34 = vld [vmem:[#allocation5 + $0x3c8] sm:$0x3]  ;;  %v316_v38 = vld [vmem:[%s8642_s29 + $0x108] sm:$0xff] }
  0x87   : > { %1122 = vmatmul.mubr.f32.vlgmr.msra.gmra.mxu1 %v297_v49  ;;  %1156 = vmatpush1.xpose.msra.mxu0 %v477_v50  ;;  %v405_v36 = vld [vmem:[#allocation5 + $0x108] sm:$0xff]  ;;  %v407_v37 = vld [vmem:[#allocation5 + $0x118] sm:$0xff]  ;;  %v404_v40 = vld [vmem:[#allocation5 + $0x100] sm:$0xff] }
  0x88   : > { %1226 = vmatpush1.xpose.msra.mxu1 %v479_v51  ;;  %1157 = vmatprep.subr.mxu0 %v389_v52  ;;  %v318_v39 = vld [vmem:[%s8642_s29 + $0x118] sm:$0xff]  ;;  %v500_v43 = vld [vmem:[#allocation5 + $0x400] sm:$0x3]  ;;  %v315_v44 = vld [vmem:[%s8642_s29 + $0x100] sm:$0xff] }
  0x89   : > { %1227 = vmatprep.subr.mxu1 %v391_v53  ;;  %1191 = vmatprep.mubr.f32.mxu0 %v300_v54  ;;  %v406_v41 = vld [vmem:[#allocation5 + $0x110] sm:$0xff]  ;;  %v317_v45 = vld [vmem:[%s8642_s29 + $0x110] sm:$0xff]  ;;  %v499_v47 = vld [vmem:[#allocation5 + $0x3f8] sm:$0x3] }
  0x8a   : > { %1261 = vmatprep.mubr.f32.mxu1 %v302_v55  ;;  %v498_v42 = vld [vmem:[#allocation5 + $0x3f0] sm:$0x3]  ;;  %v497_v46 = vld [vmem:[#allocation5 + $0x3e8] sm:$0x3]  ;;  %v411_v49 = vld [vmem:[#allocation5 + $0x138] sm:$0xff] }
  0x8b   : > { %1158 = vmatpush1.xpose.msra.mxu0 %v388_v56  ;;  %v409_v48 = vld [vmem:[#allocation5 + $0x128] sm:$0xff]  ;;  %v320_v50 = vld [vmem:[%s8642_s29 + $0x128] sm:$0xff]  ;;  %v410_v53 = vld [vmem:[#allocation5 + $0x130] sm:$0xff] }
  0x8c   : > { %1228 = vmatpush1.xpose.msra.mxu1 %v390_v57  ;;  %1295 = vmatprep.subr.mxu0 %v482_v58  ;;  %v322_v51 = vld [vmem:[%s8642_s29 + $0x138] sm:$0xff]  ;;  %v408_v52 = vld [vmem:[#allocation5 + $0x120] sm:$0xff]  ;;  %v319_v56 = vld [vmem:[%s8642_s29 + $0x120] sm:$0xff] }
  0x8d   : > { %1365 = vmatprep.subr.mxu1 %v484_v59  ;;  %v502_v54 = vld [vmem:[#allocation5 + $0x410] sm:$0x3]  ;;  %v504_v55 = vld [vmem:[#allocation5 + $0x420] sm:$0x3]  ;;  %v501_v58 = vld [vmem:[#allocation5 + $0x408] sm:$0x3] }
  0x8e   : > { %1192 = vmatmul.mubr.f32.vlgmr.msra.gmra.mxu0 %v299_v60  ;;  %v321_v57 = vld [vmem:[%s8642_s29 + $0x130] sm:$0xff]  ;;  %v503_v59 = vld [vmem:[#allocation5 + $0x418] sm:$0x3] }
  0x8f   : > { %1262 = vmatmul.mubr.f32.vlgmr.msra.gmra.mxu1 %v301_v61  ;;  %1296 = vmatpush1.xpose.msra.mxu0 %v481_v62  ;;  %v413_v60 = vld [vmem:[#allocation5 + $0x148] sm:$0xff]  ;;  %v415_v61 = vld [vmem:[#allocation5 + $0x158] sm:$0xff] }
  0x90   : > { %1366 = vmatpush1.xpose.msra.mxu1 %v483_v63  ;;  %1297 = vmatprep.subr.mxu0 %v393_v0  ;;  %v324_v62 = vld [vmem:[%s8642_s29 + $0x148] sm:$0xff]  ;;  %v326_v63 = vld [vmem:[%s8642_s29 + $0x158] sm:$0xff] }
  0x91   : > { %1367 = vmatprep.subr.mxu1 %v395_v1  ;;  %1331 = vmatprep.mubr.f32.mxu0 %v304_v2  ;;  %v412_v0 = vld [vmem:[#allocation5 + $0x140] sm:$0xff]  ;;  %v414_v1 = vld [vmem:[#allocation5 + $0x150] sm:$0xff] }
  0x92   : > { %1401 = vmatprep.mubr.f32.mxu1 %v306_v3  ;;  %v506_v2 = vld [vmem:[#allocation5 + $0x430] sm:$0x3]  ;;  %v508_v3 = vld [vmem:[#allocation5 + $0x440] sm:$0x3] }
  0x93   : > { %1298 = vmatpush1.xpose.msra.mxu0 %v392_v4  ;;  %v323_v4 = vld [vmem:[%s8642_s29 + $0x140] sm:$0xff] }
  0x94   : > { %1368 = vmatpush1.xpose.msra.mxu1 %v394_v5  ;;  %1435 = vmatprep.subr.mxu0 %v486_v6  ;;  %v325_v5 = vld [vmem:[%s8642_s29 + $0x150] sm:$0xff] }
  0x95   : > { %1505 = vmatprep.subr.mxu1 %v488_v7  ;;  %v505_v6 = vld [vmem:[#allocation5 + $0x428] sm:$0x3]  ;;  %v507_v7 = vld [vmem:[#allocation5 + $0x438] sm:$0x3] }
  0x96   : > { %1332 = vmatmul.mubr.f32.vlgmr.msra.gmra.mxu0 %v303_v8  ;;  %v417_v8 = vld [vmem:[#allocation5 + $0x168] sm:$0xff] }
  0x97   : > { %1402 = vmatmul.mubr.f32.vlgmr.msra.gmra.mxu1 %v305_v9  ;;  %1436 = vmatpush1.xpose.msra.mxu0 %v485_v10  ;;  %v419_v9 = vld [vmem:[#allocation5 + $0x178] sm:$0xff] }
  0x98   : > { %1506 = vmatpush1.xpose.msra.mxu1 %v487_v11  ;;  %1437 = vmatprep.subr.mxu0 %v397_v12  ;;  %v328_v10 = vld [vmem:[%s8642_s29 + $0x168] sm:$0xff]  ;;  %v330_v11 = vld [vmem:[%s8642_s29 + $0x178] sm:$0xff] }
  0x99   : > { %1507 = vmatprep.subr.mxu1 %v399_v13  ;;  %1471 = vmatprep.mubr.f32.mxu0 %v308_v14  ;;  %v416_v12 = vld [vmem:[#allocation5 + $0x160] sm:$0xff]  ;;  %v418_v13 = vld [vmem:[#allocation5 + $0x170] sm:$0xff] }
  0x9a   : > { %1541 = vmatprep.mubr.f32.mxu1 %v310_v15  ;;  %v510_v14 = vld [vmem:[#allocation5 + $0x450] sm:$0x3]  ;;  %v512_v15 = vld [vmem:[#allocation5 + $0x460] sm:$0x3] }
  0x9b   : > { %1438 = vmatpush1.xpose.msra.mxu0 %v396_v16  ;;  %v327_v16 = vld [vmem:[%s8642_s29 + $0x160] sm:$0xff] }
  0x9c   : > { %1508 = vmatpush1.xpose.msra.mxu1 %v398_v17  ;;  %1575 = vmatprep.subr.mxu0 %v490_v18  ;;  %v329_v17 = vld [vmem:[%s8642_s29 + $0x170] sm:$0xff] }
  0x9d   : > { %1645 = vmatprep.subr.mxu1 %v492_v19  ;;  %v509_v18 = vld [vmem:[#allocation5 + $0x448] sm:$0x3]  ;;  %v511_v19 = vld [vmem:[#allocation5 + $0x458] sm:$0x3] }
  0x9e   : > { %1472 = vmatmul.mubr.f32.vlgmr.msra.gmra.mxu0 %v307_v20  ;;  %v421_v20 = vld [vmem:[#allocation5 + $0x188] sm:$0xff] }
  0x9f   : > { %1542 = vmatmul.mubr.f32.vlgmr.msra.gmra.mxu1 %v309_v21  ;;  %1576 = vmatpush1.xpose.msra.mxu0 %v489_v22  ;;  %v423_v21 = vld [vmem:[#allocation5 + $0x198] sm:$0xff] }
  0xa0   : > { %1646 = vmatpush1.xpose.msra.mxu1 %v491_v23  ;;  %1577 = vmatprep.subr.mxu0 %v401_v24  ;;  %v332_v22 = vld [vmem:[%s8642_s29 + $0x188] sm:$0xff]  ;;  %v334_v23 = vld [vmem:[%s8642_s29 + $0x198] sm:$0xff] }
  0xa1   : > { %1647 = vmatprep.subr.mxu1 %v403_v25  ;;  %1611 = vmatprep.mubr.f32.mxu0 %v312_v26  ;;  %v420_v24 = vld [vmem:[#allocation5 + $0x180] sm:$0xff]  ;;  %v422_v25 = vld [vmem:[#allocation5 + $0x190] sm:$0xff] }
  0xa2   : > { %1681 = vmatprep.mubr.f32.mxu1 %v314_v27  ;;  %v514_v26 = vld [vmem:[#allocation5 + $0x470] sm:$0x3]  ;;  %v516_v27 = vld [vmem:[#allocation5 + $0x480] sm:$0x3] }
  0xa3   : > { %1578 = vmatpush1.xpose.msra.mxu0 %v400_v28  ;;  %v331_v28 = vld [vmem:[%s8642_s29 + $0x180] sm:$0xff] }
  0xa4   : > { %1648 = vmatpush1.xpose.msra.mxu1 %v402_v29  ;;  %1715 = vmatprep.subr.mxu0 %v494_v30  ;;  %v333_v29 = vld [vmem:[%s8642_s29 + $0x190] sm:$0xff] }
  0xa5   : > { %1785 = vmatprep.subr.mxu1 %v496_v31  ;;  %v513_v30 = vld [vmem:[#allocation5 + $0x468] sm:$0x3]  ;;  %v515_v31 = vld [vmem:[#allocation5 + $0x478] sm:$0x3] }
  0xa6   : > { %1612 = vmatmul.mubr.f32.vlgmr.msra.gmra.mxu0 %v311_v32  ;;  %v425_v32 = vld [vmem:[#allocation5 + $0x1a8] sm:$0xff] }
  0xa7   : > { %1682 = vmatmul.mubr.f32.vlgmr.msra.gmra.mxu1 %v313_v33  ;;  %1716 = vmatpush1.xpose.msra.mxu0 %v493_v34  ;;  %v427_v33 = vld [vmem:[#allocation5 + $0x1b8] sm:$0xff] }
  0xa8   : > { %1786 = vmatpush1.xpose.msra.mxu1 %v495_v35  ;;  %1717 = vmatprep.subr.mxu0 %v405_v36  ;;  %v336_v34 = vld [vmem:[%s8642_s29 + $0x1a8] sm:$0xff]  ;;  %v338_v35 = vld [vmem:[%s8642_s29 + $0x1b8] sm:$0xff] }
  0xa9   : > { %1787 = vmatprep.subr.mxu1 %v407_v37  ;;  %1751 = vmatprep.mubr.f32.mxu0 %v316_v38  ;;  %v424_v36 = vld [vmem:[#allocation5 + $0x1a0] sm:$0xff]  ;;  %v426_v37 = vld [vmem:[#allocation5 + $0x1b0] sm:$0xff] }
  0xaa   : > { %1821 = vmatprep.mubr.f32.mxu1 %v318_v39  ;;  %v518_v38 = vld [vmem:[#allocation5 + $0x490] sm:$0x3]  ;;  %v520_v39 = vld [vmem:[#allocation5 + $0x4a0] sm:$0x3] }
  0xab   : > { %1718 = vmatpush1.xpose.msra.mxu0 %v404_v40  ;;  %v335_v40 = vld [vmem:[%s8642_s29 + $0x1a0] sm:$0xff] }
  0xac   : > { %1788 = vmatpush1.xpose.msra.mxu1 %v406_v41  ;;  %1855 = vmatprep.subr.mxu0 %v498_v42  ;;  %v337_v41 = vld [vmem:[%s8642_s29 + $0x1b0] sm:$0xff] }
  0xad   : > { %1925 = vmatprep.subr.mxu1 %v500_v43  ;;  %v517_v42 = vld [vmem:[#allocation5 + $0x488] sm:$0x3]  ;;  %v519_v43 = vld [vmem:[#allocation5 + $0x498] sm:$0x3] }
  0xae   : > { %1752 = vmatmul.mubr.f32.vlgmr.msra.gmra.mxu0 %v315_v44  ;;  %v429_v44 = vld [vmem:[#allocation5 + $0x1c8] sm:$0xff] }
  0xaf   : > { %1822 = vmatmul.mubr.f32.vlgmr.msra.gmra.mxu1 %v317_v45  ;;  %1856 = vmatpush1.xpose.msra.mxu0 %v497_v46  ;;  %v431_v45 = vld [vmem:[#allocation5 + $0x1d8] sm:$0xff] }
  0xb0   : > { %1926 = vmatpush1.xpose.msra.mxu1 %v499_v47  ;;  %1857 = vmatprep.subr.mxu0 %v409_v48  ;;  %v340_v46 = vld [vmem:[%s8642_s29 + $0x1c8] sm:$0xff]  ;;  %v342_v47 = vld [vmem:[%s8642_s29 + $0x1d8] sm:$0xff] }
  0xb1   : > { %1927 = vmatprep.subr.mxu1 %v411_v49  ;;  %1891 = vmatprep.mubr.f32.mxu0 %v320_v50  ;;  %v428_v48 = vld [vmem:[#allocation5 + $0x1c0] sm:$0xff]  ;;  %v430_v49 = vld [vmem:[#allocation5 + $0x1d0] sm:$0xff] }
  0xb2   : > { %1961 = vmatprep.mubr.f32.mxu1 %v322_v51  ;;  %v522_v50 = vld [vmem:[#allocation5 + $0x4b0] sm:$0x3]  ;;  %v524_v51 = vld [vmem:[#allocation5 + $0x4c0] sm:$0x3] }
  0xb3   : > { %1858 = vmatpush1.xpose.msra.mxu0 %v408_v52  ;;  %v339_v52 = vld [vmem:[%s8642_s29 + $0x1c0] sm:$0xff] }
  0xb4   : > { %1928 = vmatpush1.xpose.msra.mxu1 %v410_v53  ;;  %1995 = vmatprep.subr.mxu0 %v502_v54  ;;  %v341_v53 = vld [vmem:[%s8642_s29 + $0x1d0] sm:$0xff] }
  0xb5   : > { %2065 = vmatprep.subr.mxu1 %v504_v55  ;;  %v521_v54 = vld [vmem:[#allocation5 + $0x4a8] sm:$0x3]  ;;  %v523_v55 = vld [vmem:[#allocation5 + $0x4b8] sm:$0x3] }
  0xb6   : > { %1892 = vmatmul.mubr.f32.vlgmr.msra.gmra.mxu0 %v319_v56  ;;  %v433_v56 = vld [vmem:[#allocation5 + $0x1e8] sm:$0xff] }
  0xb7   : > { %1962 = vmatmul.mubr.f32.vlgmr.msra.gmra.mxu1 %v321_v57  ;;  %1996 = vmatpush1.xpose.msra.mxu0 %v501_v58  ;;  %v435_v57 = vld [vmem:[#allocation5 + $0x1f8] sm:$0xff] }
  0xb8   : > { %2066 = vmatpush1.xpose.msra.mxu1 %v503_v59  ;;  %1997 = vmatprep.subr.mxu0 %v413_v60  ;;  %v344_v58 = vld [vmem:[%s8642_s29 + $0x1e8] sm:$0xff]  ;;  %v346_v59 = vld [vmem:[%s8642_s29 + $0x1f8] sm:$0xff] }
  0xb9   : > { %2067 = vmatprep.subr.mxu1 %v415_v61  ;;  %2031 = vmatprep.mubr.f32.mxu0 %v324_v62  ;;  %v432_v60 = vld [vmem:[#allocation5 + $0x1e0] sm:$0xff]  ;;  %v434_v61 = vld [vmem:[#allocation5 + $0x1f0] sm:$0xff] }
  0xba   : > { %2101 = vmatprep.mubr.f32.mxu1 %v326_v63  ;;  %v526_v62 = vld [vmem:[#allocation5 + $0x4d0] sm:$0x3]  ;;  %v528_v63 = vld [vmem:[#allocation5 + $0x4e0] sm:$0x3] }
  0xbb   : > { %1998 = vmatpush1.xpose.msra.mxu0 %v412_v0  ;;  %v343_v0 = vld [vmem:[%s8642_s29 + $0x1e0] sm:$0xff] }
  0xbc   : > { %2068 = vmatpush1.xpose.msra.mxu1 %v414_v1  ;;  %2135 = vmatprep.subr.mxu0 %v506_v2  ;;  %v345_v1 = vld [vmem:[%s8642_s29 + $0x1f0] sm:$0xff] }
  0xbd   : > { %2205 = vmatprep.subr.mxu1 %v508_v3  ;;  %v525_v2 = vld [vmem:[#allocation5 + $0x4c8] sm:$0x3]  ;;  %v527_v3 = vld [vmem:[#allocation5 + $0x4d8] sm:$0x3] }
  0xbe   : > { %2032 = vmatmul.mubr.f32.vlgmr.msra.gmra.mxu0 %v323_v4  ;;  %v437_v4 = vld [vmem:[#allocation5 + $0x208] sm:$0xff] }
  0xbf   : > { %2102 = vmatmul.mubr.f32.vlgmr.msra.gmra.mxu1 %v325_v5  ;;  %2136 = vmatpush1.xpose.msra.mxu0 %v505_v6  ;;  %v439_v5 = vld [vmem:[#allocation5 + $0x218] sm:$0xff] }
  0xc0   : > { %2206 = vmatpush1.xpose.msra.mxu1 %v507_v7  ;;  %2137 = vmatprep.subr.mxu0 %v417_v8  ;;  %v348_v6 = vld [vmem:[%s8642_s29 + $0x208] sm:$0xff]  ;;  %v350_v7 = vld [vmem:[%s8642_s29 + $0x218] sm:$0xff] }
  0xc1   : > { %2207 = vmatprep.subr.mxu1 %v419_v9  ;;  %2171 = vmatprep.mubr.f32.mxu0 %v328_v10  ;;  %v436_v8 = vld [vmem:[#allocation5 + $0x200] sm:$0xff]  ;;  %v438_v9 = vld [vmem:[#allocation5 + $0x210] sm:$0xff] }
  0xc2   : > { %2241 = vmatprep.mubr.f32.mxu1 %v330_v11  ;;  %v530_v10 = vld [vmem:[#allocation5 + $0x4f0] sm:$0x3]  ;;  %v532_v11 = vld [vmem:[#allocation5 + $0x500] sm:$0x3] }
  0xc3   : > { %2138 = vmatpush1.xpose.msra.mxu0 %v416_v12  ;;  %v347_v12 = vld [vmem:[%s8642_s29 + $0x200] sm:$0xff] }
  0xc4   : > { %2208 = vmatpush1.xpose.msra.mxu1 %v418_v13  ;;  %2275 = vmatprep.subr.mxu0 %v510_v14  ;;  %v349_v13 = vld [vmem:[%s8642_s29 + $0x210] sm:$0xff] }
  0xc5   : > { %2345 = vmatprep.subr.mxu1 %v512_v15  ;;  %v529_v14 = vld [vmem:[#allocation5 + $0x4e8] sm:$0x3]  ;;  %v531_v15 = vld [vmem:[#allocation5 + $0x4f8] sm:$0x3] }
  0xc6   : > { %2172 = vmatmul.mubr.f32.vlgmr.msra.gmra.mxu0 %v327_v16  ;;  %v441_v16 = vld [vmem:[#allocation5 + $0x228] sm:$0xff] }
  0xc7   : > { %2242 = vmatmul.mubr.f32.vlgmr.msra.gmra.mxu1 %v329_v17  ;;  %2276 = vmatpush1.xpose.msra.mxu0 %v509_v18  ;;  %v443_v17 = vld [vmem:[#allocation5 + $0x238] sm:$0xff] }
  0xc8   : > { %2346 = vmatpush1.xpose.msra.mxu1 %v511_v19  ;;  %2277 = vmatprep.subr.mxu0 %v421_v20  ;;  %v352_v18 = vld [vmem:[%s8642_s29 + $0x228] sm:$0xff]  ;;  %v354_v19 = vld [vmem:[%s8642_s29 + $0x238] sm:$0xff] }
  0xc9   : > { %2347 = vmatprep.subr.mxu1 %v423_v21  ;;  %2311 = vmatprep.mubr.f32.mxu0 %v332_v22  ;;  %v440_v20 = vld [vmem:[#allocation5 + $0x220] sm:$0xff]  ;;  %v442_v21 = vld [vmem:[#allocation5 + $0x230] sm:$0xff] }
  0xca   : > { %2381 = vmatprep.mubr.f32.mxu1 %v334_v23  ;;  %v534_v22 = vld [vmem:[#allocation5 + $0x510] sm:$0x3]  ;;  %v536_v23 = vld [vmem:[#allocation5 + $0x520] sm:$0x3] }
  0xcb   : > { %2278 = vmatpush1.xpose.msra.mxu0 %v420_v24  ;;  %v351_v24 = vld [vmem:[%s8642_s29 + $0x220] sm:$0xff] }
  0xcc   : > { %2348 = vmatpush1.xpose.msra.mxu1 %v422_v25  ;;  %2415 = vmatprep.subr.mxu0 %v514_v26  ;;  %v353_v25 = vld [vmem:[%s8642_s29 + $0x230] sm:$0xff] }
  0xcd   : > { %2485 = vmatprep.subr.mxu1 %v516_v27  ;;  %v533_v26 = vld [vmem:[#allocation5 + $0x508] sm:$0x3]  ;;  %v535_v27 = vld [vmem:[#allocation5 + $0x518] sm:$0x3] }
  0xce   : > { %2312 = vmatmul.mubr.f32.vlgmr.msra.gmra.mxu0 %v331_v28  ;;  %v445_v28 = vld [vmem:[#allocation5 + $0x248] sm:$0xff] }
  0xcf   : > { %2382 = vmatmul.mubr.f32.vlgmr.msra.gmra.mxu1 %v333_v29  ;;  %2416 = vmatpush1.xpose.msra.mxu0 %v513_v30  ;;  %v447_v29 = vld [vmem:[#allocation5 + $0x258] sm:$0xff] }
  0xd0   : > { %2486 = vmatpush1.xpose.msra.mxu1 %v515_v31  ;;  %2417 = vmatprep.subr.mxu0 %v425_v32  ;;  %v356_v30 = vld [vmem:[%s8642_s29 + $0x248] sm:$0xff]  ;;  %v358_v31 = vld [vmem:[%s8642_s29 + $0x258] sm:$0xff] }
  0xd1   : > { %2487 = vmatprep.subr.mxu1 %v427_v33  ;;  %2451 = vmatprep.mubr.f32.mxu0 %v336_v34  ;;  %v444_v32 = vld [vmem:[#allocation5 + $0x240] sm:$0xff]  ;;  %v446_v33 = vld [vmem:[#allocation5 + $0x250] sm:$0xff] }
  0xd2   : > { %2521 = vmatprep.mubr.f32.mxu1 %v338_v35  ;;  %v538_v34 = vld [vmem:[#allocation5 + $0x530] sm:$0x3]  ;;  %v540_v35 = vld [vmem:[#allocation5 + $0x540] sm:$0x3] }
  0xd3   : > { %2418 = vmatpush1.xpose.msra.mxu0 %v424_v36  ;;  %v355_v36 = vld [vmem:[%s8642_s29 + $0x240] sm:$0xff] }
  0xd4   : > { %2488 = vmatpush1.xpose.msra.mxu1 %v426_v37  ;;  %2555 = vmatprep.subr.mxu0 %v518_v38  ;;  %v357_v37 = vld [vmem:[%s8642_s29 + $0x250] sm:$0xff] }
  0xd5   : > { %2625 = vmatprep.subr.mxu1 %v520_v39  ;;  %v537_v38 = vld [vmem:[#allocation5 + $0x528] sm:$0x3]  ;;  %v539_v39 = vld [vmem:[#allocation5 + $0x538] sm:$0x3] }
  0xd6   : > { %2452 = vmatmul.mubr.f32.vlgmr.msra.gmra.mxu0 %v335_v40  ;;  %v449_v40 = vld [vmem:[#allocation5 + $0x268] sm:$0xff] }
  0xd7   : > { %2522 = vmatmul.mubr.f32.vlgmr.msra.gmra.mxu1 %v337_v41  ;;  %2556 = vmatpush1.xpose.msra.mxu0 %v517_v42  ;;  %v451_v41 = vld [vmem:[#allocation5 + $0x278] sm:$0xff] }
  0xd8   : > { %2626 = vmatpush1.xpose.msra.mxu1 %v519_v43  ;;  %2557 = vmatprep.subr.mxu0 %v429_v44  ;;  %v360_v42 = vld [vmem:[%s8642_s29 + $0x268] sm:$0xff]  ;;  %v362_v43 = vld [vmem:[%s8642_s29 + $0x278] sm:$0xff] }
  0xd9   : > { %2627 = vmatprep.subr.mxu1 %v431_v45  ;;  %2591 = vmatprep.mubr.f32.mxu0 %v340_v46  ;;  %v448_v44 = vld [vmem:[#allocation5 + $0x260] sm:$0xff]  ;;  %v450_v45 = vld [vmem:[#allocation5 + $0x270] sm:$0xff] }
  0xda   : > { %2661 = vmatprep.mubr.f32.mxu1 %v342_v47  ;;  %v542_v46 = vld [vmem:[#allocation5 + $0x550] sm:$0x3]  ;;  %v544_v47 = vld [vmem:[#allocation5 + $0x560] sm:$0x3] }
  0xdb   : > { %2558 = vmatpush1.xpose.msra.mxu0 %v428_v48  ;;  %v359_v48 = vld [vmem:[%s8642_s29 + $0x260] sm:$0xff] }
  0xdc   : > { %2628 = vmatpush1.xpose.msra.mxu1 %v430_v49  ;;  %2695 = vmatprep.subr.mxu0 %v522_v50  ;;  %v361_v49 = vld [vmem:[%s8642_s29 + $0x270] sm:$0xff] }
  0xdd   : > { %2765 = vmatprep.subr.mxu1 %v524_v51  ;;  %v541_v50 = vld [vmem:[#allocation5 + $0x548] sm:$0x3]  ;;  %v543_v51 = vld [vmem:[#allocation5 + $0x558] sm:$0x3] }
  0xde   : > { %2592 = vmatmul.mubr.f32.vlgmr.msra.gmra.mxu0 %v339_v52  ;;  %v453_v52 = vld [vmem:[#allocation5 + $0x288] sm:$0xff] }
  0xdf   : > { %2662 = vmatmul.mubr.f32.vlgmr.msra.gmra.mxu1 %v341_v53  ;;  %2696 = vmatpush1.xpose.msra.mxu0 %v521_v54  ;;  %v455_v53 = vld [vmem:[#allocation5 + $0x298] sm:$0xff] }
  0xe0   : > { %2766 = vmatpush1.xpose.msra.mxu1 %v523_v55  ;;  %2697 = vmatprep.subr.mxu0 %v433_v56  ;;  %v364_v54 = vld [vmem:[%s8642_s29 + $0x288] sm:$0xff]  ;;  %v366_v55 = vld [vmem:[%s8642_s29 + $0x298] sm:$0xff] }
  0xe1   : > { %2767 = vmatprep.subr.mxu1 %v435_v57  ;;  %2731 = vmatprep.mubr.f32.mxu0 %v344_v58  ;;  %v452_v56 = vld [vmem:[#allocation5 + $0x280] sm:$0xff]  ;;  %v454_v57 = vld [vmem:[#allocation5 + $0x290] sm:$0xff] }
  0xe2   : > { %2801 = vmatprep.mubr.f32.mxu1 %v346_v59  ;;  %v546_v58 = vld [vmem:[#allocation5 + $0x570] sm:$0x3]  ;;  %v548_v59 = vld [vmem:[#allocation5 + $0x580] sm:$0x3] }
  0xe3   : > { %2698 = vmatpush1.xpose.msra.mxu0 %v432_v60  ;;  %v363_v60 = vld [vmem:[%s8642_s29 + $0x280] sm:$0xff] }
  0xe4   : > { %2768 = vmatpush1.xpose.msra.mxu1 %v434_v61  ;;  %2835 = vmatprep.subr.mxu0 %v526_v62  ;;  %v365_v61 = vld [vmem:[%s8642_s29 + $0x290] sm:$0xff] }
  0xe5   : > { %2905 = vmatprep.subr.mxu1 %v528_v63  ;;  %v545_v62 = vld [vmem:[#allocation5 + $0x568] sm:$0x3]  ;;  %v547_v63 = vld [vmem:[#allocation5 + $0x578] sm:$0x3] }
  0xe6   : > { %2732 = vmatmul.mubr.f32.vlgmr.msra.gmra.mxu0 %v343_v0  ;;  %v457_v0 = vld [vmem:[#allocation5 + $0x2a8] sm:$0xff] }
  0xe7   : > { %2802 = vmatmul.mubr.f32.vlgmr.msra.gmra.mxu1 %v345_v1  ;;  %2836 = vmatpush1.xpose.msra.mxu0 %v525_v2  ;;  %v459_v1 = vld [vmem:[#allocation5 + $0x2b8] sm:$0xff] }
  0xe8   : > { %2906 = vmatpush1.xpose.msra.mxu1 %v527_v3  ;;  %2837 = vmatprep.subr.mxu0 %v437_v4  ;;  %v368_v2 = vld [vmem:[%s8642_s29 + $0x2a8] sm:$0xff]  ;;  %v370_v3 = vld [vmem:[%s8642_s29 + $0x2b8] sm:$0xff] }
  0xe9   : > { %2907 = vmatprep.subr.mxu1 %v439_v5  ;;  %2871 = vmatprep.mubr.f32.mxu0 %v348_v6  ;;  %v456_v4 = vld [vmem:[#allocation5 + $0x2a0] sm:$0xff]  ;;  %v458_v5 = vld [vmem:[#allocation5 + $0x2b0] sm:$0xff] }
  0xea   : > { %2941 = vmatprep.mubr.f32.mxu1 %v350_v7  ;;  %v367_v6 = vld [vmem:[%s8642_s29 + $0x2a0] sm:$0xff]  ;;  %v369_v7 = vld [vmem:[%s8642_s29 + $0x2b0] sm:$0xff] }
  0xeb   : > { %2838 = vmatpush1.xpose.msra.mxu0 %v436_v8  ;;  %v8477_v8 = vmov 0.0  }
  0xec   : > { %2908 = vmatpush1.xpose.msra.mxu1 %v438_v9  ;;  %2975 = vmatprep.subr.mxu0 %v530_v10  ;;  %v549_v9 = vld [vmem:[#allocation5 + $0x588] sm:$0x3]  ;;  %v460_v10 = vld [vmem:[#allocation5 + $0x2c0] sm:$0xff] }
  0xed   : > { %3045 = vmatprep.subr.mxu1 %v532_v11  ;;  %v371_v11 = vld [vmem:[%s8642_s29 + $0x2c0] sm:$0xff] }
  0xee   : > { %2872 = vmatmul.mubr.f32.vlgmr.msra.gmra.mxu0 %v347_v12  ;;  %v8044_v12 = vld [vmem:[%s9320_s2] ss:$0 sm:$0xff] }
  0xef   : > { %2942 = vmatmul.mubr.f32.vlgmr.msra.gmra.mxu1 %v349_v13  ;;  %2976 = vmatpush1.xpose.msra.mxu0 %v529_v14 }
  0xf0   : > { %3046 = vmatpush1.xpose.msra.mxu1 %v531_v15  ;;  %2977 = vmatprep.subr.mxu0 %v441_v16 }
  0xf1   : > { %3047 = vmatprep.subr.mxu1 %v443_v17  ;;  %3011 = vmatprep.mubr.f32.mxu0 %v352_v18 }
  0xf2   : > { %3081 = vmatprep.mubr.f32.mxu1 %v354_v19 }
  0xf3   : > { %2978 = vmatpush1.xpose.msra.mxu0 %v440_v20 }
  0xf4   : > { %3048 = vmatpush1.xpose.msra.mxu1 %v442_v21  ;;  %3115 = vmatprep.subr.mxu0 %v534_v22 }
  0xf5   : > { %3185 = vmatprep.subr.mxu1 %v536_v23 }
  0xf6   : > { %3012 = vmatmul.mubr.f32.vlgmr.msra.gmra.mxu0 %v351_v24 }
  0xf7   : > { %3082 = vmatmul.mubr.f32.vlgmr.msra.gmra.mxu1 %v353_v25  ;;  %3116 = vmatpush1.xpose.msra.mxu0 %v533_v26 }
  0xf8   : > { %3186 = vmatpush1.xpose.msra.mxu1 %v535_v27  ;;  %3117 = vmatprep.subr.mxu0 %v445_v28 }
  0xf9   : > { %3187 = vmatprep.subr.mxu1 %v447_v29  ;;  %3151 = vmatprep.mubr.f32.mxu0 %v356_v30 }
  0xfa   : > { %3221 = vmatprep.mubr.f32.mxu1 %v358_v31 }
  0xfb   : > { %3118 = vmatpush1.xpose.msra.mxu0 %v444_v32 }
  0xfc   : > { %3188 = vmatpush1.xpose.msra.mxu1 %v446_v33  ;;  %3255 = vmatprep.subr.mxu0 %v538_v34 }
  0xfd   : > { %3325 = vmatprep.subr.mxu1 %v540_v35 }
  0xfe   : > { %3152 = vmatmul.mubr.f32.vlgmr.msra.gmra.mxu0 %v355_v36 }
  0xff   : > { %3222 = vmatmul.mubr.f32.vlgmr.msra.gmra.mxu1 %v357_v37  ;;  %3256 = vmatpush1.xpose.msra.mxu0 %v537_v38 }
 0x100   : > { %3326 = vmatpush1.xpose.msra.mxu1 %v539_v39  ;;  %3257 = vmatprep.subr.mxu0 %v449_v40 }
 0x101   : > { %3327 = vmatprep.subr.mxu1 %v451_v41  ;;  %3291 = vmatprep.mubr.f32.mxu0 %v360_v42 }
 0x102   : > { %3361 = vmatprep.mubr.f32.mxu1 %v362_v43 }
 0x103   : > { %3258 = vmatpush1.xpose.msra.mxu0 %v448_v44 }
 0x104   : > { %3328 = vmatpush1.xpose.msra.mxu1 %v450_v45  ;;  %3395 = vmatprep.subr.mxu0 %v542_v46 }
 0x105   : > { %3465 = vmatprep.subr.mxu1 %v544_v47 }
 0x106   : > { %3292 = vmatmul.mubr.f32.vlgmr.msra.gmra.mxu0 %v359_v48 }
 0x107   : > { %3362 = vmatmul.mubr.f32.vlgmr.msra.gmra.mxu1 %v361_v49  ;;  %3396 = vmatpush1.xpose.msra.mxu0 %v541_v50  ;;  %v3807_v49 = vld [vmem:[#allocation7 + $0x2d0] sm:$0x3]  ;;  %v3806_v50 = vld [vmem:[#allocation7 + $0x2c8] sm:$0x3] }
 0x108   : > { %3466 = vmatpush1.xpose.msra.mxu1 %v543_v51  ;;  %3397 = vmatprep.subr.mxu0 %v453_v52  ;;  %v3811_v51 = vld [vmem:[#allocation7 + $0x2f0] sm:$0x3]  ;;  %v3810_v52 = vld [vmem:[#allocation7 + $0x2e8] sm:$0x3] }
 0x109   : > { %3467 = vmatprep.subr.mxu1 %v455_v53  ;;  %3431 = vmatprep.mubr.f32.mxu0 %v364_v54 }
 0x10a   : > { %3501 = vmatprep.mubr.f32.mxu1 %v366_v55  ;;  %v3718_v55 = vld [vmem:[#allocation7 + $0x8] sm:$0xff] }
 0x10b   : > { %3398 = vmatpush1.xpose.msra.mxu0 %v452_v56  ;;  %v3722_v56 = vld [vmem:[#allocation7 + $0x28] sm:$0xff] }
 0x10c   : > { %3468 = vmatpush1.xpose.msra.mxu1 %v454_v57  ;;  %3535 = vmatprep.subr.mxu0 %v546_v58  ;;  %v3717_v58 = vld [vmem:[#allocation7] sm:$0xff] }
 0x10d   : > { %3605 = vmatprep.subr.mxu1 %v548_v59  ;;  %v3721_v59 = vld [vmem:[#allocation7 + $0x20] sm:$0xff] }
 0x10e   : > { %3432 = vmatmul.mubr.f32.vlgmr.msra.gmra.mxu0 %v363_v60 }
 0x10f   : > { %3502 = vmatmul.mubr.f32.vlgmr.msra.gmra.mxu1 %v365_v61  ;;  %3536 = vmatpush1.xpose.msra.mxu0 %v545_v62  ;;  %v3809_v62 = vld [vmem:[#allocation7 + $0x2e0] sm:$0x3] }
 0x110   : > { %3606 = vmatpush1.xpose.msra.mxu1 %v547_v63  ;;  %3537 = vmatprep.subr.mxu0 %v457_v0  ;;  %v3815_v63 = vld [vmem:[#allocation7 + $0x310] sm:$0x3] }
 0x111   : > { %3607 = vmatprep.subr.mxu1 %v459_v1  ;;  %3571 = vmatprep.mubr.f32.mxu0 %v368_v2 }
 0x112   : > { %3641 = vmatprep.mubr.f32.mxu1 %v370_v3 }
 0x113   : > { %3538 = vmatpush1.xpose.msra.mxu0 %v456_v4 }
 0x114   : > { %3608 = vmatpush1.xpose.msra.mxu1 %v458_v5  ;;  %8192 = vmatprep.subr.mxu0 %v8477_v8 }
 0x115   : > { %8049 = vmatprep.subr.msk.mxu1 %vm4368_vm2, %v3807_v49 }
 0x116   : > { %3572 = vmatmul.mubr.f32.vlgmr.msra.gmra.mxu0 %v367_v6 }
 0x117   : > { %3642 = vmatmul.mubr.f32.vlgmr.msra.gmra.mxu1 %v369_v7  ;;  %8193 = vmatpush3.xpose.msk.msra.mxu0 %vm557_vm0, %v549_v9 }
 0x118   : > { %8196 = vmatprep.mubr.msk.f32.mxu0 %vm8478_vm1, %v8477_v8  ;;  %8194 = vmatprep.subr.mxu0 %v8477_v8 }
 0x119   : > { %4700 = vmatprep.mubr.f32.mxu1 %v8477_v8  ;;  %8050 = vmatpush1.msk.msra.mxu1 %vm4368_vm2, %v3806_v50 }
 0x11a   : > { %4666 = vmatprep.subr.mxu1 %v3718_v55 }
 0x11b   : > { %8195 = vmatpush3.xpose.msk.msra.mxu0 %vm557_vm0, %v460_v10  ;;  %4667 = vmatpush1.msra.mxu1 %v3717_v58 }
 0x11c   : > { %8055 = vmatprep.subr.msk.mxu0 %vm4368_vm2, %v3811_v51  ;;  %8052 = vmatprep.subr.msk.mxu1 %vm4368_vm2, %v3809_v62 }
 0x11e   : > { %8197 = vmatmul.mubr.msk.f32.vlgmr.msra.gmra.mxu0 %vm557_vm0, %v371_v11 }
 0x11f   : > { %4842 = vmatprep.mubr.f32.mxu0 %v8477_v8  ;;  %8056 = vmatpush1.msk.msra.mxu0 %vm4368_vm2, %v3810_v52 }
 0x120   : > { %4808 = vmatprep.subr.mxu0 %v3722_v56 }
 0x121   : > { %4809 = vmatpush1.msra.mxu0 %v3721_v59 }
 0x122   : > { %8061 = vmatprep.subr.msk.mxu0 %vm4368_vm2, %v3815_v63 }
 0x12e   : > { %v633_v13 = vpop.f32.mrf.mxu0 }
 0x12f   : > { %v703_v14 = vpop.f32.mrf.mxu1  ;;  %v634_v15 = vadd.f32 %v8044_v12, %v633_v13 }
 0x130   : > { %v635_v16 = vpop.f32.mrf.mxu0 }
 0x131   : > { %v705_v17 = vpop.f32.mrf.mxu1  ;;  %v704_v18 = vadd.f32 %v703_v14, %v634_v15 }
 0x136   : > { %v773_v19 = vpop.f32.mrf.mxu0 }
 0x137   : > { %v843_v20 = vpop.f32.mrf.mxu1  ;;  %v774_v21 = vadd.f32 %v773_v19, %v704_v18 }
 0x138   : > { %v775_v22 = vpop.f32.mrf.mxu0 }
 0x139   : > { %v845_v23 = vpop.f32.mrf.mxu1  ;;  %v844_v24 = vadd.f32 %v843_v20, %v774_v21 }
 0x13e   : > { %v913_v25 = vpop.f32.mrf.mxu0 }
 0x13f   : > { %v983_v26 = vpop.f32.mrf.mxu1  ;;  %v914_v27 = vadd.f32 %v913_v25, %v844_v24 }
 0x140   : > { %v915_v28 = vpop.f32.mrf.mxu0 }
 0x141   : > { %v985_v29 = vpop.f32.mrf.mxu1  ;;  %v984_v30 = vadd.f32 %v983_v26, %v914_v27 }
 0x146   : > { %v1053_v31 = vpop.f32.mrf.mxu0 }
 0x147   : > { %v1123_v32 = vpop.f32.mrf.mxu1  ;;  %v1054_v33 = vadd.f32 %v1053_v31, %v984_v30 }
 0x148   : > { %v1055_v34 = vpop.f32.mrf.mxu0 }
 0x149   : > { %v1125_v35 = vpop.f32.mrf.mxu1  ;;  %v1124_v36 = vadd.f32 %v1123_v32, %v1054_v33 }
 0x14e   : > { %v1193_v37 = vpop.f32.mrf.mxu0 }
 0x14f   : > { %v1263_v38 = vpop.f32.mrf.mxu1  ;;  %v1194_v39 = vadd.f32 %v1193_v37, %v1124_v36 }
 0x150   : > { %v1195_v40 = vpop.f32.mrf.mxu0 }
 0x151   : > { %v1265_v41 = vpop.f32.mrf.mxu1  ;;  %v1264_v42 = vadd.f32 %v1263_v38, %v1194_v39 }
 0x156   : > { %v1333_v43 = vpop.f32.mrf.mxu0 }
 0x157   : > { %v1403_v44 = vpop.f32.mrf.mxu1  ;;  %v1334_v45 = vadd.f32 %v1333_v43, %v1264_v42 }
 0x158   : > { %v1335_v46 = vpop.f32.mrf.mxu0 }
 0x159   : > { %v1405_v47 = vpop.f32.mrf.mxu1  ;;  %v1404_v48 = vadd.f32 %v1403_v44, %v1334_v45 }
 0x15e   : > { %v1473_v53 = vpop.f32.mrf.mxu0 }
 0x15f   : > { %v1543_v54 = vpop.f32.mrf.mxu1  ;;  %v1474_v57 = vadd.f32 %v1473_v53, %v1404_v48 }
 0x160   : > { %v1475_v60 = vpop.f32.mrf.mxu0 }
 0x161   : > { %v1545_v61 = vpop.f32.mrf.mxu1  ;;  %v1544_v0 = vadd.f32 %v1543_v54, %v1474_v57 }
 0x166   : > { %v1613_v1 = vpop.f32.mrf.mxu0 }
 0x167   : > { %v1683_v2 = vpop.f32.mrf.mxu1  ;;  %v1614_v18 = vadd.f32 %v1613_v1, %v1544_v0 }
 0x168   : > { %v1615_v3 = vpop.f32.mrf.mxu0 }
 0x169   : > { %v1685_v4 = vpop.f32.mrf.mxu1  ;;  %v1684_v23 = vadd.f32 %v1683_v2, %v1614_v18 }
 0x16e   : > { %v1753_v5 = vpop.f32.mrf.mxu0 }
 0x16f   : > { %v1823_v6 = vpop.f32.mrf.mxu1  ;;  %v1754_v24 = vadd.f32 %v1753_v5, %v1684_v23 }
 0x170   : > { %v1755_v7 = vpop.f32.mrf.mxu0 }
 0x171   : > { %v1825_v9 = vpop.f32.mrf.mxu1  ;;  %v1824_v27 = vadd.f32 %v1823_v6, %v1754_v24 }
 0x176   : > { %v1893_v10 = vpop.f32.mrf.mxu0 }
 0x177   : > { %v1963_v11 = vpop.f32.mrf.mxu1  ;;  %v1894_v30 = vadd.f32 %v1893_v10, %v1824_v27 }
 0x178   : > { %v1895_v12 = vpop.f32.mrf.mxu0 }
 0x179   : > { %v1965_v13 = vpop.f32.mrf.mxu1  ;;  %v1964_v31 = vadd.f32 %v1963_v11, %v1894_v30 }
 0x17e   : > { %v2033_v14 = vpop.f32.mrf.mxu0 }
 0x17f   : > { %v2103_v15 = vpop.f32.mrf.mxu1  ;;  %v2034_v34 = vadd.f32 %v2033_v14, %v1964_v31  ;;  %v3808_v31 = vld [vmem:[#allocation7 + $0x2d8] sm:$0x3] }
 0x180   : > { %v2035_v16 = vpop.f32.mrf.mxu0 }
 0x181   : > { %v2105_v17 = vpop.f32.mrf.mxu1  ;;  %v2104_v37 = vadd.f32 %v2103_v15, %v2034_v34  ;;  %v3720_v34 = vld [vmem:[#allocation7 + $0x18] sm:$0xff] }
 0x186   : > { %v2173_v19 = vpop.f32.mrf.mxu0 }
 0x187   : > { %v2243_v20 = vpop.f32.mrf.mxu1  ;;  %v2174_v38 = vadd.f32 %v2173_v19, %v2104_v37  ;;  %v3813_v37 = vld [vmem:[#allocation7 + $0x300] sm:$0x3] }
 0x188   : > { %v2175_v21 = vpop.f32.mrf.mxu0 }
 0x189   : > { %v2245_v22 = vpop.f32.mrf.mxu1  ;;  %v2244_v43 = vadd.f32 %v2243_v20, %v2174_v38  ;;  %v3725_v38 = vld [vmem:[#allocation7 + $0x40] sm:$0xff] }
 0x18e   : > { %v2313_v25 = vpop.f32.mrf.mxu0 }
 0x18f   : > { %v2383_v26 = vpop.f32.mrf.mxu1  ;;  %v2314_v44 = vadd.f32 %v2313_v25, %v2244_v43  ;;  %v3723_v43 = vld [vmem:[#allocation7 + $0x30] sm:$0xff] }
 0x190   : > { %v2315_v28 = vpop.f32.mrf.mxu0 }
 0x191   : > { %v2385_v29 = vpop.f32.mrf.mxu1  ;;  %v2384_v47 = vadd.f32 %v2383_v26, %v2314_v44  ;;  %v3730_v44 = vld [vmem:[#allocation7 + $0x68] sm:$0xff] }
 0x196   : > { %v2453_v32 = vpop.f32.mrf.mxu0 }
 0x197   : > { %v2523_v33 = vpop.f32.mrf.mxu1  ;;  %v2454_v50 = vadd.f32 %v2453_v32, %v2384_v47  ;;  %v3814_v32 = vld [vmem:[#allocation7 + $0x308] sm:$0x3]  ;;  %v3816_v47 = vld [vmem:[#allocation7 + $0x318] sm:$0x3] }
 0x198   : > { %v2455_v35 = vpop.f32.mrf.mxu0 }
 0x199   : > { %v2525_v36 = vpop.f32.mrf.mxu1  ;;  %v2524_v51 = vadd.f32 %v2523_v33, %v2454_v50  ;;  %v3726_v35 = vld [vmem:[#allocation7 + $0x48] sm:$0xff] }
 0x19a   : > { %v3719_v36 = vld [vmem:[#allocation7 + $0x10] sm:$0xff]  ;;  %v3822_v50 = vld [vmem:[#allocation7 + $0x348] sm:$0x3] }
 0x19e   : > { %v2593_v39 = vpop.f32.mrf.mxu0 }
 0x19f   : > { %v2663_v40 = vpop.f32.mrf.mxu1  ;;  %v2594_v54 = vadd.f32 %v2593_v39, %v2524_v51  ;;  %v3812_v39 = vld [vmem:[#allocation7 + $0x2f8] sm:$0x3]  ;;  %v3727_v51 = vld [vmem:[#allocation7 + $0x50] sm:$0xff] }
 0x1a0   : > { %v2595_v41 = vpop.f32.mrf.mxu0 }
 0x1a1   : > { %v2665_v42 = vpop.f32.mrf.mxu1  ;;  %v2664_v57 = vadd.f32 %v2663_v40, %v2594_v54  ;;  %v3819_v40 = vld [vmem:[#allocation7 + $0x330] sm:$0x3]  ;;  %v3724_v41 = vld [vmem:[#allocation7 + $0x38] sm:$0xff]  ;;  %v3733_v54 = vld [vmem:[#allocation7 + $0x80] sm:$0xff] }
 0x1a2   : > { %v3818_v42 = vld [vmem:[#allocation7 + $0x328] sm:$0x3] }
 0x1a6   : > { %v2733_v45 = vpop.f32.mrf.mxu0 }
 0x1a7   : > { %v2803_v46 = vpop.f32.mrf.mxu1  ;;  %v2734_v58 = vadd.f32 %v2733_v45, %v2664_v57  ;;  %v3817_v45 = vld [vmem:[#allocation7 + $0x320] sm:$0x3]  ;;  %v3732_v57 = vld [vmem:[#allocation7 + $0x78] sm:$0xff] }
 0x1a8   : > { %v2735_v48 = vpop.f32.mrf.mxu0 }
 0x1a9   : > { %v2805_v49 = vpop.f32.mrf.mxu1  ;;  %v2804_v63 = vadd.f32 %v2803_v46, %v2734_v58  ;;  %v3729_v46 = vld [vmem:[#allocation7 + $0x60] sm:$0xff]  ;;  %v3823_v48 = vld [vmem:[#allocation7 + $0x350] sm:$0x3]  ;;  %v3826_v58 = vld [vmem:[#allocation7 + $0x368] sm:$0x3] }
 0x1aa   : > { %v3728_v49 = vld [vmem:[#allocation7 + $0x58] sm:$0xff] }
 0x1ae   : > { %v2873_v52 = vpop.f32.mrf.mxu0 }
 0x1af   : > { %v2943_v53 = vpop.f32.mrf.mxu1  ;;  %v2874_v0 = vadd.f32 %v2873_v52, %v2804_v63  ;;  %v3734_v52 = vld [vmem:[#allocation7 + $0x88] sm:$0xff]  ;;  %v3824_v63 = vld [vmem:[#allocation7 + $0x358] sm:$0x3] }
 0x1b0   : > { %v2875_v55 = vpop.f32.mrf.mxu0 }
 0x1b1   : > { %v2945_v56 = vpop.f32.mrf.mxu1  ;;  %v2944_v3 = vadd.f32 %v2943_v53, %v2874_v0  ;;  %v3821_v53 = vld [vmem:[#allocation7 + $0x340] sm:$0x3]  ;;  %v3820_v55 = vld [vmem:[#allocation7 + $0x338] sm:$0x3]  ;;  %v3831_v0 = vld [vmem:[#allocation7 + $0x390] sm:$0x3] }
 0x1b2   : > { %v3827_v56 = vld [vmem:[#allocation7 + $0x370] sm:$0x3] }
 0x1b6   : > { %v3013_v59 = vpop.f32.mrf.mxu0 }
 0x1b7   : > { %v3083_v60 = vpop.f32.mrf.mxu1  ;;  %v3014_v6 = vadd.f32 %v3013_v59, %v2944_v3  ;;  %v3731_v59 = vld [vmem:[#allocation7 + $0x70] sm:$0xff] }
 0x1b8   : > { %v3015_v61 = vpop.f32.mrf.mxu0  ;;  %v3735_v3 = vld [vmem:[#allocation7 + $0x90] sm:$0xff] }
 0x1b9   : > { %v3085_v62 = vpop.f32.mrf.mxu1  ;;  %v3084_v7 = vadd.f32 %v3083_v60, %v3014_v6  ;;  %v3738_v60 = vld [vmem:[#allocation7 + $0xa8] sm:$0xff]  ;;  %v3825_v61 = vld [vmem:[#allocation7 + $0x360] sm:$0x3] }
 0x1ba   : > { %v3737_v62 = vld [vmem:[#allocation7 + $0xa0] sm:$0xff] }
 0x1bb   : > { %v3741_v6 = vld [vmem:[#allocation7 + $0xc0] sm:$0xff] }
 0x1be   : > { %v3153_v1 = vpop.f32.mrf.mxu0 }
 0x1bf   : > { %v3223_v2 = vpop.f32.mrf.mxu1  ;;  %v3154_v11 = vadd.f32 %v3153_v1, %v3084_v7  ;;  %v3736_v1 = vld [vmem:[#allocation7 + $0x98] sm:$0xff] }
 0x1c0   : > { %v3155_v4 = vpop.f32.mrf.mxu0  ;;  %v3828_v7 = vld [vmem:[#allocation7 + $0x378] sm:$0x3] }
 0x1c1   : > { %v3225_v5 = vpop.f32.mrf.mxu1  ;;  %v3224_v14 = vadd.f32 %v3223_v2, %v3154_v11  ;;  %v3830_v2 = vld [vmem:[#allocation7 + $0x388] sm:$0x3] }
 0x1c2   : > { %v3742_v4 = vld [vmem:[#allocation7 + $0xc8] sm:$0xff]  ;;  %v3829_v5 = vld [vmem:[#allocation7 + $0x380] sm:$0x3] }
 0x1c3   : > { %v3834_v11 = vld [vmem:[#allocation7 + $0x3a8] sm:$0x3] }
 0x1c6   : > { %v3293_v9 = vpop.f32.mrf.mxu0 }
 0x1c7   : > { %v3363_v10 = vpop.f32.mrf.mxu1  ;;  %v3294_v15 = vadd.f32 %v3293_v9, %v3224_v14  ;;  %v3835_v9 = vld [vmem:[#allocation7 + $0x3b0] sm:$0x3]  ;;  %v3833_v14 = vld [vmem:[#allocation7 + $0x3a0] sm:$0x3] }
 0x1c8   : > { %v3295_v12 = vpop.f32.mrf.mxu0 }
 0x1c9   : > { %v3365_v13 = vpop.f32.mrf.mxu1  ;;  %v3364_v20 = vadd.f32 %v3363_v10, %v3294_v15  ;;  %v3740_v10 = vld [vmem:[#allocation7 + $0xb8] sm:$0xff]  ;;  %v3739_v12 = vld [vmem:[#allocation7 + $0xb0] sm:$0xff]  ;;  %v3745_v15 = vld [vmem:[#allocation7 + $0xe0] sm:$0xff] }
 0x1ca   : > { %v3746_v13 = vld [vmem:[#allocation7 + $0xe8] sm:$0xff] }
 0x1ce   : > { %v3433_v16 = vpop.f32.mrf.mxu0 }
 0x1cf   : > { %v3503_v17 = vpop.f32.mrf.mxu1  ;;  %v3434_v21 = vadd.f32 %v3433_v16, %v3364_v20  ;;  %v3832_v16 = vld [vmem:[#allocation7 + $0x398] sm:$0x3]  ;;  %v3743_v20 = vld [vmem:[#allocation7 + $0xd0] sm:$0xff] }
 0x1d0   : > { %v3435_v18 = vpop.f32.mrf.mxu0 }
 0x1d1   : > { %v3505_v19 = vpop.f32.mrf.mxu1  ;;  %v3504_v24 = vadd.f32 %v3503_v17, %v3434_v21  ;;  %v3839_v17 = vld [vmem:[#allocation7 + $0x3d0] sm:$0x3]  ;;  %v3744_v18 = vld [vmem:[#allocation7 + $0xd8] sm:$0xff]  ;;  %v3750_v21 = vld [vmem:[#allocation7 + $0x108] sm:$0xff] }
 0x1d2   : > { %v3838_v19 = vld [vmem:[#allocation7 + $0x3c8] sm:$0x3] }
 0x1d6   : > { %v3573_v22 = vpop.f32.mrf.mxu0 }
 0x1d7   : > { %v3643_v23 = vpop.f32.mrf.mxu1  ;;  %v3574_v27 = vadd.f32 %v3573_v22, %v3504_v24  ;;  %v3837_v22 = vld [vmem:[#allocation7 + $0x3c0] sm:$0x3]  ;;  %v3836_v24 = vld [vmem:[#allocation7 + $0x3b8] sm:$0x3] }
 0x1d8   : > { %v3575_v25 = vpop.f32.mrf.mxu0 }
 0x1d9   : > { %v3645_v26 = vpop.f32.mrf.mxu1  ;;  %v3644_v28 = vadd.f32 %v3643_v23, %v3574_v27  ;;  %v3749_v23 = vld [vmem:[#allocation7 + $0x100] sm:$0xff]  ;;  %v3843_v25 = vld [vmem:[#allocation7 + $0x3f0] sm:$0x3]  ;;  %v3842_v27 = vld [vmem:[#allocation7 + $0x3e8] sm:$0x3] }
 0x1da   : > { %v3748_v26 = vld [vmem:[#allocation7 + $0xf8] sm:$0xff] }
 0x1de   : > { %v3713_v29 = vpop.f32.mrf.mxu0 }
 0x1df   : > { %v8763_v30 = vadd.f32 %v3713_v29, %v3644_v28  ;;  %v3747_v28 = vld [vmem:[#allocation7 + $0xf0] sm:$0xff]  ;;  %v3754_v29 = vld [vmem:[#allocation7 + $0x128] sm:$0xff] }
 0x1e0   : > { %v8198_v33 = vpop.f32.mrf.mxu0 }
 0x1e1   : > { %8051 = vmatmul.mubr.msk.f32.vlgmr.msra.gmra.mxu1 %vm4364_vm3, %v8763_v30  ;;  %8057 = vmatmul.mubr.msk.f32.vlgmr.msra.gmra.mxu0 %vm4364_vm3, %v8763_v30  ;;  %v3840_v33 = vld [vmem:[#allocation7 + $0x3d8] sm:$0x3] }
 0x1e2   : > { %8053 = vmatpush1.msk.msra.mxu1 %vm4368_vm2, %v3808_v31  ;;  %8062 = vmatpush1.msk.msra.mxu0 %vm4368_vm2, %v3814_v32  ;;  %v3841_v31 = vld [vmem:[#allocation7 + $0x3e0] sm:$0x3] }
 0x1e3   : > { %4737 = vmatprep.subr.mxu1 %v3720_v34  ;;  %4950 = vmatprep.subr.mxu0 %v3726_v35  ;;  %v3753_v32 = vld [vmem:[#allocation7 + $0x120] sm:$0xff]  ;;  %v3847_v34 = vld [vmem:[#allocation7 + $0x410] sm:$0x3]  ;;  %v3752_v35 = vld [vmem:[#allocation7 + $0x118] sm:$0xff] }
 0x1e4   : > { %4738 = vmatpush1.msra.mxu1 %v3719_v36  ;;  %4771 = vmatprep.mubr.f32.mxu1 %v8477_v8  ;;  %v3846_v36 = vld [vmem:[#allocation7 + $0x408] sm:$0x3] }
 0x1e5   : > { %8058 = vmatprep.subr.msk.mxu1 %vm4368_vm2, %v3813_v37  ;;  %4951 = vmatpush1.msra.mxu0 %v3725_v38  ;;  %v3751_v37 = vld [vmem:[#allocation7 + $0x110] sm:$0xff]  ;;  %v3758_v38 = vld [vmem:[#allocation7 + $0x148] sm:$0xff] }
 0x1e6   : > { %4984 = vmatprep.mubr.f32.mxu0 %v8477_v8  ;;  %8054 = vmatmul.mubr.msk.f32.vlgmr.msra.gmra.mxu1 %vm4364_vm3, %v8763_v30 }
 0x1e7   : > { %8059 = vmatpush1.msk.msra.mxu1 %vm4368_vm2, %v3812_v39  ;;  %8063 = vmatmul.mubr.msk.f32.vlgmr.msra.gmra.mxu0 %vm4364_vm3, %v8763_v30  ;;  %v3845_v39 = vld [vmem:[#allocation7 + $0x400] sm:$0x3] }
 0x1e8   : > { %8067 = vmatprep.subr.msk.mxu0 %vm4368_vm2, %v3819_v40  ;;  %4879 = vmatprep.subr.mxu1 %v3724_v41  ;;  %v3757_v40 = vld [vmem:[#allocation7 + $0x140] sm:$0xff]  ;;  %v3844_v41 = vld [vmem:[#allocation7 + $0x3f8] sm:$0x3] }
 0x1e9   : > { %8068 = vmatpush1.msk.msra.mxu0 %vm4368_vm2, %v3818_v42  ;;  %4880 = vmatpush1.msra.mxu1 %v3723_v43  ;;  %v3851_v42 = vld [vmem:[#allocation7 + $0x430] sm:$0x3]  ;;  %v3756_v43 = vld [vmem:[#allocation7 + $0x138] sm:$0xff] }
 0x1ea   : > { %5092 = vmatprep.subr.mxu0 %v3730_v44  ;;  %4913 = vmatprep.mubr.f32.mxu1 %v8477_v8  ;;  %v3850_v44 = vld [vmem:[#allocation7 + $0x428] sm:$0x3] }
 0x1eb   : > { %8064 = vmatprep.subr.msk.mxu1 %vm4368_vm2, %v3817_v45  ;;  %5093 = vmatpush1.msra.mxu0 %v3729_v46  ;;  %v3755_v45 = vld [vmem:[#allocation7 + $0x130] sm:$0xff]  ;;  %v3762_v46 = vld [vmem:[#allocation7 + $0x168] sm:$0xff] }
 0x1ec   : > { %5126 = vmatprep.mubr.f32.mxu0 %v8477_v8  ;;  %8060 = vmatmul.mubr.msk.f32.vlgmr.msra.gmra.mxu1 %vm4364_vm3, %v8763_v30 }
 0x1ed   : > { %8065 = vmatpush1.msk.msra.mxu1 %vm4368_vm2, %v3816_v47  ;;  %8069 = vmatmul.mubr.msk.f32.vlgmr.msra.gmra.mxu0 %vm4364_vm3, %v8763_v30  ;;  %v3849_v47 = vld [vmem:[#allocation7 + $0x420] sm:$0x3] }
 0x1ee   : > { %8073 = vmatprep.subr.msk.mxu0 %vm4368_vm2, %v3823_v48  ;;  %5021 = vmatprep.subr.mxu1 %v3728_v49  ;;  %v3761_v48 = vld [vmem:[#allocation7 + $0x160] sm:$0xff]  ;;  %v3848_v49 = vld [vmem:[#allocation7 + $0x418] sm:$0x3] }
 0x1ef   : > { %8074 = vmatpush1.msk.msra.mxu0 %vm4368_vm2, %v3822_v50  ;;  %5022 = vmatpush1.msra.mxu1 %v3727_v51  ;;  %v3855_v50 = vld [vmem:[#allocation7 + $0x450] sm:$0x3]  ;;  %v3760_v51 = vld [vmem:[#allocation7 + $0x158] sm:$0xff] }
 0x1f0   : > { %5234 = vmatprep.subr.mxu0 %v3734_v52  ;;  %5055 = vmatprep.mubr.f32.mxu1 %v8477_v8  ;;  %v3854_v52 = vld [vmem:[#allocation7 + $0x448] sm:$0x3] }
 0x1f1   : > { %8070 = vmatprep.subr.msk.mxu1 %vm4368_vm2, %v3821_v53  ;;  %5235 = vmatpush1.msra.mxu0 %v3733_v54  ;;  %v3759_v53 = vld [vmem:[#allocation7 + $0x150] sm:$0xff]  ;;  %v3766_v54 = vld [vmem:[#allocation7 + $0x188] sm:$0xff] }
 0x1f2   : > { %5268 = vmatprep.mubr.f32.mxu0 %v8477_v8  ;;  %8066 = vmatmul.mubr.msk.f32.vlgmr.msra.gmra.mxu1 %vm4364_vm3, %v8763_v30 }
 0x1f3   : > { %8071 = vmatpush1.msk.msra.mxu1 %vm4368_vm2, %v3820_v55  ;;  %8075 = vmatmul.mubr.msk.f32.vlgmr.msra.gmra.mxu0 %vm4364_vm3, %v8763_v30  ;;  %v3853_v55 = vld [vmem:[#allocation7 + $0x440] sm:$0x3] }
 0x1f4   : > { %8079 = vmatprep.subr.msk.mxu0 %vm4368_vm2, %v3827_v56  ;;  %5163 = vmatprep.subr.mxu1 %v3732_v57  ;;  %v3765_v56 = vld [vmem:[#allocation7 + $0x180] sm:$0xff]  ;;  %v3852_v57 = vld [vmem:[#allocation7 + $0x438] sm:$0x3] }
 0x1f5   : > { %8080 = vmatpush1.msk.msra.mxu0 %vm4368_vm2, %v3826_v58  ;;  %5164 = vmatpush1.msra.mxu1 %v3731_v59  ;;  %v3859_v58 = vld [vmem:[#allocation7 + $0x470] sm:$0x3]  ;;  %v3764_v59 = vld [vmem:[#allocation7 + $0x178] sm:$0xff] }
 0x1f6   : > { %5376 = vmatprep.subr.mxu0 %v3738_v60  ;;  %5197 = vmatprep.mubr.f32.mxu1 %v8477_v8  ;;  %v3858_v60 = vld [vmem:[#allocation7 + $0x468] sm:$0x3] }
 0x1f7   : > { %8076 = vmatprep.subr.msk.mxu1 %vm4368_vm2, %v3825_v61  ;;  %5377 = vmatpush1.msra.mxu0 %v3737_v62  ;;  %v3763_v61 = vld [vmem:[#allocation7 + $0x170] sm:$0xff]  ;;  %v3770_v62 = vld [vmem:[#allocation7 + $0x1a8] sm:$0xff] }
 0x1f8   : > { %5410 = vmatprep.mubr.f32.mxu0 %v8477_v8  ;;  %8072 = vmatmul.mubr.msk.f32.vlgmr.msra.gmra.mxu1 %vm4364_vm3, %v8763_v30 }
 0x1f9   : > { %8077 = vmatpush1.msk.msra.mxu1 %vm4368_vm2, %v3824_v63  ;;  %8081 = vmatmul.mubr.msk.f32.vlgmr.msra.gmra.mxu0 %vm4364_vm3, %v8763_v30  ;;  %v3857_v63 = vld [vmem:[#allocation7 + $0x460] sm:$0x3] }
 0x1fa   : > { %8085 = vmatprep.subr.msk.mxu0 %vm4368_vm2, %v3831_v0  ;;  %5305 = vmatprep.subr.mxu1 %v3736_v1  ;;  %v3769_v0 = vld [vmem:[#allocation7 + $0x1a0] sm:$0xff]  ;;  %v3856_v1 = vld [vmem:[#allocation7 + $0x458] sm:$0x3] }
 0x1fb   : > { %8086 = vmatpush1.msk.msra.mxu0 %vm4368_vm2, %v3830_v2  ;;  %5306 = vmatpush1.msra.mxu1 %v3735_v3  ;;  %v3863_v2 = vld [vmem:[#allocation7 + $0x490] sm:$0x3]  ;;  %v3768_v3 = vld [vmem:[#allocation7 + $0x198] sm:$0xff] }
 0x1fc   : > { %5518 = vmatprep.subr.mxu0 %v3742_v4  ;;  %5339 = vmatprep.mubr.f32.mxu1 %v8477_v8  ;;  %v3862_v4 = vld [vmem:[#allocation7 + $0x488] sm:$0x3] }
 0x1fd   : > { %8082 = vmatprep.subr.msk.mxu1 %vm4368_vm2, %v3829_v5  ;;  %5519 = vmatpush1.msra.mxu0 %v3741_v6  ;;  %v3767_v5 = vld [vmem:[#allocation7 + $0x190] sm:$0xff]  ;;  %v3774_v6 = vld [vmem:[#allocation7 + $0x1c8] sm:$0xff] }
 0x1fe   : > { %5552 = vmatprep.mubr.f32.mxu0 %v8477_v8  ;;  %8078 = vmatmul.mubr.msk.f32.vlgmr.msra.gmra.mxu1 %vm4364_vm3, %v8763_v30 }
 0x1ff   : > { %8083 = vmatpush1.msk.msra.mxu1 %vm4368_vm2, %v3828_v7  ;;  %8087 = vmatmul.mubr.msk.f32.vlgmr.msra.gmra.mxu0 %vm4364_vm3, %v8763_v30  ;;  %v3861_v7 = vld [vmem:[#allocation7 + $0x480] sm:$0x3] }
 0x200   : > { %8091 = vmatprep.subr.msk.mxu0 %vm4368_vm2, %v3835_v9  ;;  %5447 = vmatprep.subr.mxu1 %v3740_v10  ;;  %v3773_v9 = vld [vmem:[#allocation7 + $0x1c0] sm:$0xff]  ;;  %v3860_v10 = vld [vmem:[#allocation7 + $0x478] sm:$0x3] }
 0x201   : > { %8092 = vmatpush1.msk.msra.mxu0 %vm4368_vm2, %v3834_v11  ;;  %5448 = vmatpush1.msra.mxu1 %v3739_v12  ;;  %v3867_v11 = vld [vmem:[#allocation7 + $0x4b0] sm:$0x3]  ;;  %v3772_v12 = vld [vmem:[#allocation7 + $0x1b8] sm:$0xff] }
 0x202   : > { %5660 = vmatprep.subr.mxu0 %v3746_v13  ;;  %5481 = vmatprep.mubr.f32.mxu1 %v8477_v8  ;;  %v3866_v13 = vld [vmem:[#allocation7 + $0x4a8] sm:$0x3] }
 0x203   : > { %8088 = vmatprep.subr.msk.mxu1 %vm4368_vm2, %v3833_v14  ;;  %5661 = vmatpush1.msra.mxu0 %v3745_v15  ;;  %v3771_v14 = vld [vmem:[#allocation7 + $0x1b0] sm:$0xff]  ;;  %v3778_v15 = vld [vmem:[#allocation7 + $0x1e8] sm:$0xff] }
 0x204   : > { %5694 = vmatprep.mubr.f32.mxu0 %v8477_v8  ;;  %8084 = vmatmul.mubr.msk.f32.vlgmr.msra.gmra.mxu1 %vm4364_vm3, %v8763_v30 }
 0x205   : > { %8089 = vmatpush1.msk.msra.mxu1 %vm4368_vm2, %v3832_v16  ;;  %8093 = vmatmul.mubr.msk.f32.vlgmr.msra.gmra.mxu0 %vm4364_vm3, %v8763_v30  ;;  %v3865_v16 = vld [vmem:[#allocation7 + $0x4a0] sm:$0x3] }
 0x206   : > { %8097 = vmatprep.subr.msk.mxu0 %vm4368_vm2, %v3839_v17  ;;  %5589 = vmatprep.subr.mxu1 %v3744_v18  ;;  %v3777_v17 = vld [vmem:[#allocation7 + $0x1e0] sm:$0xff]  ;;  %v3864_v18 = vld [vmem:[#allocation7 + $0x498] sm:$0x3] }
 0x207   : > { %8098 = vmatpush1.msk.msra.mxu0 %vm4368_vm2, %v3838_v19  ;;  %5590 = vmatpush1.msra.mxu1 %v3743_v20  ;;  %v3871_v19 = vld [vmem:[#allocation7 + $0x4d0] sm:$0x3]  ;;  %v3776_v20 = vld [vmem:[#allocation7 + $0x1d8] sm:$0xff] }
 0x208   : > { %5802 = vmatprep.subr.mxu0 %v3750_v21  ;;  %5623 = vmatprep.mubr.f32.mxu1 %v8477_v8  ;;  %v3870_v21 = vld [vmem:[#allocation7 + $0x4c8] sm:$0x3] }
 0x209   : > { %8094 = vmatprep.subr.msk.mxu1 %vm4368_vm2, %v3837_v22  ;;  %5803 = vmatpush1.msra.mxu0 %v3749_v23  ;;  %v3775_v22 = vld [vmem:[#allocation7 + $0x1d0] sm:$0xff]  ;;  %v3782_v23 = vld [vmem:[#allocation7 + $0x208] sm:$0xff] }
 0x20a   : > { %5836 = vmatprep.mubr.f32.mxu0 %v8477_v8  ;;  %8090 = vmatmul.mubr.msk.f32.vlgmr.msra.gmra.mxu1 %vm4364_vm3, %v8763_v30 }
 0x20b   : > { %8095 = vmatpush1.msk.msra.mxu1 %vm4368_vm2, %v3836_v24  ;;  %8099 = vmatmul.mubr.msk.f32.vlgmr.msra.gmra.mxu0 %vm4364_vm3, %v8763_v30  ;;  %v3869_v24 = vld [vmem:[#allocation7 + $0x4c0] sm:$0x3] }
 0x20c   : > { %8103 = vmatprep.subr.msk.mxu0 %vm4368_vm2, %v3843_v25  ;;  %5731 = vmatprep.subr.mxu1 %v3748_v26  ;;  %v3781_v25 = vld [vmem:[#allocation7 + $0x200] sm:$0xff]  ;;  %v3868_v26 = vld [vmem:[#allocation7 + $0x4b8] sm:$0x3] }
 0x20d   : > { %8104 = vmatpush1.msk.msra.mxu0 %vm4368_vm2, %v3842_v27  ;;  %5732 = vmatpush1.msra.mxu1 %v3747_v28  ;;  %v3875_v27 = vld [vmem:[#allocation7 + $0x4f0] sm:$0x3]  ;;  %v3780_v28 = vld [vmem:[#allocation7 + $0x1f8] sm:$0xff] }
 0x20e   : > { %5944 = vmatprep.subr.mxu0 %v3754_v29  ;;  %5765 = vmatprep.mubr.f32.mxu1 %v8477_v8  ;;  %v3874_v29 = vld [vmem:[#allocation7 + $0x4e8] sm:$0x3] }
 0x20f   : > { %8100 = vmatprep.subr.msk.mxu1 %vm4368_vm2, %v3841_v31  ;;  %5945 = vmatpush1.msra.mxu0 %v3753_v32  ;;  %v3779_v31 = vld [vmem:[#allocation7 + $0x1f0] sm:$0xff]  ;;  %v3786_v32 = vld [vmem:[#allocation7 + $0x228] sm:$0xff] }
 0x210   : > { %5978 = vmatprep.mubr.f32.mxu0 %v8477_v8  ;;  %8096 = vmatmul.mubr.msk.f32.vlgmr.msra.gmra.mxu1 %vm4364_vm3, %v8763_v30 }
 0x211   : > { %8101 = vmatpush1.msk.msra.mxu1 %vm4368_vm2, %v3840_v33  ;;  %8105 = vmatmul.mubr.msk.f32.vlgmr.msra.gmra.mxu0 %vm4364_vm3, %v8763_v30  ;;  %v3873_v33 = vld [vmem:[#allocation7 + $0x4e0] sm:$0x3] }
 0x212   : > { %8109 = vmatprep.subr.msk.mxu0 %vm4368_vm2, %v3847_v34  ;;  %5873 = vmatprep.subr.mxu1 %v3752_v35  ;;  %v3785_v34 = vld [vmem:[#allocation7 + $0x220] sm:$0xff]  ;;  %v3872_v35 = vld [vmem:[#allocation7 + $0x4d8] sm:$0x3] }
 0x213   : > { %8110 = vmatpush1.msk.msra.mxu0 %vm4368_vm2, %v3846_v36  ;;  %5874 = vmatpush1.msra.mxu1 %v3751_v37  ;;  %v3879_v36 = vld [vmem:[#allocation7 + $0x510] sm:$0x3]  ;;  %v3784_v37 = vld [vmem:[#allocation7 + $0x218] sm:$0xff] }
 0x214   : > { %6086 = vmatprep.subr.mxu0 %v3758_v38  ;;  %5907 = vmatprep.mubr.f32.mxu1 %v8477_v8  ;;  %v3878_v38 = vld [vmem:[#allocation7 + $0x508] sm:$0x3] }
 0x215   : > { %8106 = vmatprep.subr.msk.mxu1 %vm4368_vm2, %v3845_v39  ;;  %6087 = vmatpush1.msra.mxu0 %v3757_v40  ;;  %v3783_v39 = vld [vmem:[#allocation7 + $0x210] sm:$0xff]  ;;  %v3790_v40 = vld [vmem:[#allocation7 + $0x248] sm:$0xff] }
 0x216   : > { %6120 = vmatprep.mubr.f32.mxu0 %v8477_v8  ;;  %8102 = vmatmul.mubr.msk.f32.vlgmr.msra.gmra.mxu1 %vm4364_vm3, %v8763_v30 }
 0x217   : > { %8107 = vmatpush1.msk.msra.mxu1 %vm4368_vm2, %v3844_v41  ;;  %8111 = vmatmul.mubr.msk.f32.vlgmr.msra.gmra.mxu0 %vm4364_vm3, %v8763_v30  ;;  %v3877_v41 = vld [vmem:[#allocation7 + $0x500] sm:$0x3] }
 0x218   : > { %8115 = vmatprep.subr.msk.mxu0 %vm4368_vm2, %v3851_v42  ;;  %6015 = vmatprep.subr.mxu1 %v3756_v43  ;;  %v3789_v42 = vld [vmem:[#allocation7 + $0x240] sm:$0xff]  ;;  %v3876_v43 = vld [vmem:[#allocation7 + $0x4f8] sm:$0x3] }
 0x219   : > { %8116 = vmatpush1.msk.msra.mxu0 %vm4368_vm2, %v3850_v44  ;;  %6016 = vmatpush1.msra.mxu1 %v3755_v45  ;;  %v3883_v44 = vld [vmem:[#allocation7 + $0x530] sm:$0x3]  ;;  %v3788_v45 = vld [vmem:[#allocation7 + $0x238] sm:$0xff] }
 0x21a   : > { %6228 = vmatprep.subr.mxu0 %v3762_v46  ;;  %6049 = vmatprep.mubr.f32.mxu1 %v8477_v8  ;;  %v3882_v46 = vld [vmem:[#allocation7 + $0x528] sm:$0x3] }
 0x21b   : > { %8112 = vmatprep.subr.msk.mxu1 %vm4368_vm2, %v3849_v47  ;;  %6229 = vmatpush1.msra.mxu0 %v3761_v48  ;;  %v3787_v47 = vld [vmem:[#allocation7 + $0x230] sm:$0xff]  ;;  %v3794_v48 = vld [vmem:[#allocation7 + $0x268] sm:$0xff] }
 0x21c   : > { %6262 = vmatprep.mubr.f32.mxu0 %v8477_v8  ;;  %8108 = vmatmul.mubr.msk.f32.vlgmr.msra.gmra.mxu1 %vm4364_vm3, %v8763_v30 }
 0x21d   : > { %8113 = vmatpush1.msk.msra.mxu1 %vm4368_vm2, %v3848_v49  ;;  %8117 = vmatmul.mubr.msk.f32.vlgmr.msra.gmra.mxu0 %vm4364_vm3, %v8763_v30  ;;  %v3881_v49 = vld [vmem:[#allocation7 + $0x520] sm:$0x3] }
 0x21e   : > { %8121 = vmatprep.subr.msk.mxu0 %vm4368_vm2, %v3855_v50  ;;  %6157 = vmatprep.subr.mxu1 %v3760_v51  ;;  %v3793_v50 = vld [vmem:[#allocation7 + $0x260] sm:$0xff]  ;;  %v3880_v51 = vld [vmem:[#allocation7 + $0x518] sm:$0x3] }
 0x21f   : > { %8122 = vmatpush1.msk.msra.mxu0 %vm4368_vm2, %v3854_v52  ;;  %6158 = vmatpush1.msra.mxu1 %v3759_v53  ;;  %v3887_v52 = vld [vmem:[#allocation7 + $0x550] sm:$0x3]  ;;  %v3792_v53 = vld [vmem:[#allocation7 + $0x258] sm:$0xff] }
 0x220   : > { %6370 = vmatprep.subr.mxu0 %v3766_v54  ;;  %6191 = vmatprep.mubr.f32.mxu1 %v8477_v8  ;;  %v3886_v54 = vld [vmem:[#allocation7 + $0x548] sm:$0x3] }
 0x221   : > { %8118 = vmatprep.subr.msk.mxu1 %vm4368_vm2, %v3853_v55  ;;  %6371 = vmatpush1.msra.mxu0 %v3765_v56  ;;  %v3791_v55 = vld [vmem:[#allocation7 + $0x250] sm:$0xff]  ;;  %v3798_v56 = vld [vmem:[#allocation7 + $0x288] sm:$0xff] }
 0x222   : > { %6404 = vmatprep.mubr.f32.mxu0 %v8477_v8  ;;  %8114 = vmatmul.mubr.msk.f32.vlgmr.msra.gmra.mxu1 %vm4364_vm3, %v8763_v30 }
 0x223   : > { %8119 = vmatpush1.msk.msra.mxu1 %vm4368_vm2, %v3852_v57  ;;  %8123 = vmatmul.mubr.msk.f32.vlgmr.msra.gmra.mxu0 %vm4364_vm3, %v8763_v30  ;;  %v3885_v57 = vld [vmem:[#allocation7 + $0x540] sm:$0x3] }
 0x224   : > { %8127 = vmatprep.subr.msk.mxu0 %vm4368_vm2, %v3859_v58  ;;  %6299 = vmatprep.subr.mxu1 %v3764_v59  ;;  %v3797_v58 = vld [vmem:[#allocation7 + $0x280] sm:$0xff]  ;;  %v3884_v59 = vld [vmem:[#allocation7 + $0x538] sm:$0x3] }
 0x225   : > { %8128 = vmatpush1.msk.msra.mxu0 %vm4368_vm2, %v3858_v60  ;;  %6300 = vmatpush1.msra.mxu1 %v3763_v61  ;;  %v3891_v60 = vld [vmem:[#allocation7 + $0x570] sm:$0x3]  ;;  %v3796_v61 = vld [vmem:[#allocation7 + $0x278] sm:$0xff] }
 0x226   : > { %6512 = vmatprep.subr.mxu0 %v3770_v62  ;;  %6333 = vmatprep.mubr.f32.mxu1 %v8477_v8  ;;  %v3890_v62 = vld [vmem:[#allocation7 + $0x568] sm:$0x3] }
 0x227   : > { %8124 = vmatprep.subr.msk.mxu1 %vm4368_vm2, %v3857_v63  ;;  %6513 = vmatpush1.msra.mxu0 %v3769_v0  ;;  %v3795_v63 = vld [vmem:[#allocation7 + $0x270] sm:$0xff]  ;;  %v3802_v0 = vld [vmem:[#allocation7 + $0x2a8] sm:$0xff] }
 0x228   : > { %6546 = vmatprep.mubr.f32.mxu0 %v8477_v8  ;;  %8120 = vmatmul.mubr.msk.f32.vlgmr.msra.gmra.mxu1 %vm4364_vm3, %v8763_v30 }
 0x229   : > { %8125 = vmatpush1.msk.msra.mxu1 %vm4368_vm2, %v3856_v1  ;;  %8129 = vmatmul.mubr.msk.f32.vlgmr.msra.gmra.mxu0 %vm4364_vm3, %v8763_v30  ;;  %v3889_v1 = vld [vmem:[#allocation7 + $0x560] sm:$0x3] }
 0x22a   : > { %8133 = vmatprep.subr.msk.mxu0 %vm4368_vm2, %v3863_v2  ;;  %6441 = vmatprep.subr.mxu1 %v3768_v3  ;;  %v3801_v2 = vld [vmem:[#allocation7 + $0x2a0] sm:$0xff]  ;;  %v3888_v3 = vld [vmem:[#allocation7 + $0x558] sm:$0x3] }
 0x22b   : > { %8134 = vmatpush1.msk.msra.mxu0 %vm4368_vm2, %v3862_v4  ;;  %6442 = vmatpush1.msra.mxu1 %v3767_v5  ;;  %v3800_v4 = vld [vmem:[#allocation7 + $0x298] sm:$0xff]  ;;  %v3894_v5 = vld [vmem:[#allocation7 + $0x588] sm:$0x3] }
 0x22c   : > { %6654 = vmatprep.subr.mxu0 %v3774_v6  ;;  %6475 = vmatprep.mubr.f32.mxu1 %v8477_v8  ;;  %v3799_v6 = vld [vmem:[#allocation7 + $0x290] sm:$0xff] }
 0x22d   : > { %8130 = vmatprep.subr.msk.mxu1 %vm4368_vm2, %v3861_v7  ;;  %6655 = vmatpush1.msra.mxu0 %v3773_v9  ;;  %v3893_v7 = vld [vmem:[#allocation7 + $0x580] sm:$0x3] }
 0x22e   : > { %6688 = vmatprep.mubr.f32.mxu0 %v8477_v8  ;;  %8126 = vmatmul.mubr.msk.f32.vlgmr.msra.gmra.mxu1 %vm4364_vm3, %v8763_v30  ;;  %v3805_v9 = vld [vmem:[#allocation7 + $0x2c0] sm:$0xff] }
 0x22f   : > { %8131 = vmatpush1.msk.msra.mxu1 %vm4368_vm2, %v3860_v10  ;;  %8135 = vmatmul.mubr.msk.f32.vlgmr.msra.gmra.mxu0 %vm4364_vm3, %v8763_v30  ;;  %v3892_v10 = vld [vmem:[#allocation7 + $0x578] sm:$0x3] }
 0x230   : > { %8139 = vmatprep.subr.msk.mxu0 %vm4368_vm2, %v3867_v11  ;;  %6583 = vmatprep.subr.mxu1 %v3772_v12  ;;  %v3804_v11 = vld [vmem:[#allocation7 + $0x2b8] sm:$0xff]  ;;  %v3803_v12 = vld [vmem:[#allocation7 + $0x2b0] sm:$0xff] }
 0x231   : > { %8140 = vmatpush1.msk.msra.mxu0 %vm4368_vm2, %v3866_v13  ;;  %6584 = vmatpush1.msra.mxu1 %v3771_v14  ;;  %v3919_v13 = vlaneseq }
 0x232   : > { %6796 = vmatprep.subr.mxu0 %v3778_v15  ;;  %6617 = vmatprep.mubr.f32.mxu1 %v8477_v8 }
 0x233   : > { %8136 = vmatprep.subr.msk.mxu1 %vm4368_vm2, %v3865_v16  ;;  %6797 = vmatpush1.msra.mxu0 %v3777_v17  ;;  %v3920_v14 = vshrl.u32 %v3919_v13, 7  ;;  %v3895_v17 = vld [vmem:[#allocation8] sm:$0xff] }
 0x234   : > { %6830 = vmatprep.mubr.f32.mxu0 %v8477_v8  ;;  %8132 = vmatmul.mubr.msk.f32.vlgmr.msra.gmra.mxu1 %vm4364_vm3, %v8763_v30 }
 0x235   : > { %8137 = vmatpush1.msk.msra.mxu1 %vm4368_vm2, %v3864_v18  ;;  %8141 = vmatmul.mubr.msk.f32.vlgmr.msra.gmra.mxu0 %vm4364_vm3, %v8763_v30  ;;  %v8984_v15 = vsub.s32 0, %v3920_v14  ;;  %v8986_v16 = vsub.s32 4, %v3920_v14  ;;  %v8988_v18 = vsub.s32 1, %v3920_v14 }
 0x236   : > { %8145 = vmatprep.subr.msk.mxu0 %vm4368_vm2, %v3871_v19  ;;  %6725 = vmatprep.subr.mxu1 %v3776_v20  ;;  %v8990_v19 = vsub.s32 5, %v3920_v14 }
 0x237   : > { %8146 = vmatpush1.msk.msra.mxu0 %vm4368_vm2, %v3870_v21  ;;  %6726 = vmatpush1.msra.mxu1 %v3775_v22  ;;  %v3922_v20 = vrot.slane %v3895_v17, %v8984_v15  ;;  %v8994_v21 = vsub.s32 2, %v3920_v14 }
 0x238   : > { %6938 = vmatprep.subr.mxu0 %v3782_v23  ;;  %6759 = vmatprep.mubr.f32.mxu1 %v8477_v8  ;;  %v3942_v22 = vrot.slane %v3895_v17, %v8990_v19 }
 0x239   : > { %8142 = vmatprep.subr.msk.mxu1 %vm4368_vm2, %v3869_v24  ;;  %6939 = vmatpush1.msra.mxu0 %v3781_v25  ;;  %v8998_v25 = vld [vmem:[#allocation8 + $0x8] sm:$0xff] }
 0x23a   : > { %6972 = vmatprep.mubr.f32.mxu0 %v8477_v8  ;;  %8138 = vmatmul.mubr.msk.f32.vlgmr.msra.gmra.mxu1 %vm4364_vm3, %v8763_v30 }
 0x23b   : > { %8143 = vmatpush1.msk.msra.mxu1 %vm4368_vm2, %v3868_v26  ;;  %8147 = vmatmul.mubr.msk.f32.vlgmr.msra.gmra.mxu0 %vm4364_vm3, %v8763_v30  ;;  %v9000_v26 = vsub.s32 3, %v3920_v14 }
 0x23c   : > { %8151 = vmatprep.subr.msk.mxu0 %vm4368_vm2, %v3875_v27  ;;  %6867 = vmatprep.subr.mxu1 %v3780_v28 }
 0x23d   : > { %8152 = vmatpush1.msk.msra.mxu0 %vm4368_vm2, %v3874_v29  ;;  %6868 = vmatpush1.msra.mxu1 %v3779_v31 }
 0x23e   : > { %7080 = vmatprep.subr.mxu0 %v3786_v32  ;;  %6901 = vmatprep.mubr.f32.mxu1 %v8477_v8  ;;  %v3930_v32 = vrot.slane %v3895_v17, %v8994_v21 }
 0x23f   : > { %8148 = vmatprep.subr.msk.mxu1 %vm4368_vm2, %v3873_v33  ;;  %7081 = vmatpush1.msra.mxu0 %v3785_v34 }
 0x240   : > { %7114 = vmatprep.mubr.f32.mxu0 %v8477_v8  ;;  %8144 = vmatmul.mubr.msk.f32.vlgmr.msra.gmra.mxu1 %vm4364_vm3, %v8763_v30 }
 0x241   : > { %8149 = vmatpush1.msk.msra.mxu1 %vm4368_vm2, %v3872_v35  ;;  %8153 = vmatmul.mubr.msk.f32.vlgmr.msra.gmra.mxu0 %vm4364_vm3, %v8763_v30  ;;  %v3954_v35 = vrot.slane %v8998_v25, %v8984_v15 }
 0x242   : > { %8157 = vmatprep.subr.msk.mxu0 %vm4368_vm2, %v3879_v36  ;;  %7009 = vmatprep.subr.mxu1 %v3784_v37  ;;  %v3934_v36 = vrot.slane %v3895_v17, %v9000_v26  ;;  %v9012_v37 = vsub.s32 6, %v3920_v14 }
 0x243   : > { %8158 = vmatpush1.msk.msra.mxu0 %vm4368_vm2, %v3878_v38  ;;  %7010 = vmatpush1.msra.mxu1 %v3783_v39  ;;  %v3958_v39 = vrot.slane %v8998_v25, %v8988_v18 }
 0x244   : > { %7222 = vmatprep.subr.mxu0 %v3790_v40  ;;  %7043 = vmatprep.mubr.f32.mxu1 %v8477_v8 }
 0x245   : > { %8154 = vmatprep.subr.msk.mxu1 %vm4368_vm2, %v3877_v41  ;;  %7223 = vmatpush1.msra.mxu0 %v3789_v42  ;;  %v9018_v42 = vsub.s32 7, %v3920_v14 }
 0x246   : > { %7256 = vmatprep.mubr.f32.mxu0 %v8477_v8  ;;  %8150 = vmatmul.mubr.msk.f32.vlgmr.msra.gmra.mxu1 %vm4364_vm3, %v8763_v30 }
 0x247   : > { %8155 = vmatpush1.msk.msra.mxu1 %vm4368_vm2, %v3876_v43  ;;  %8159 = vmatmul.mubr.msk.f32.vlgmr.msra.gmra.mxu0 %vm4364_vm3, %v8763_v30 }
 0x248   : > { %8163 = vmatprep.subr.msk.mxu0 %vm4368_vm2, %v3883_v44  ;;  %7151 = vmatprep.subr.mxu1 %v3788_v45 }
 0x249   : > { %8164 = vmatpush1.msk.msra.mxu0 %vm4368_vm2, %v3882_v46  ;;  %7152 = vmatpush1.msra.mxu1 %v3787_v47  ;;  %v3946_v47 = vrot.slane %v3895_v17, %v9012_v37 }
 0x24a   : > { %7364 = vmatprep.subr.mxu0 %v3794_v48  ;;  %7185 = vmatprep.mubr.f32.mxu1 %v8477_v8 }
 0x24b   : > { %8160 = vmatprep.subr.msk.mxu1 %vm4368_vm2, %v3881_v49  ;;  %7365 = vmatpush1.msra.mxu0 %v3793_v50  ;;  %v3970_v49 = vrot.slane %v8998_v25, %v8986_v16  ;;  %v3950_v50 = vrot.slane %v3895_v17, %v9018_v42 }
 0x24c   : > { %7398 = vmatprep.mubr.f32.mxu0 %v8477_v8  ;;  %8156 = vmatmul.mubr.msk.f32.vlgmr.msra.gmra.mxu1 %vm4364_vm3, %v8763_v30 }
 0x24d   : > { %8161 = vmatpush1.msk.msra.mxu1 %vm4368_vm2, %v3880_v51  ;;  %8165 = vmatmul.mubr.msk.f32.vlgmr.msra.gmra.mxu0 %vm4364_vm3, %v8763_v30 }
 0x24e   : > { %8169 = vmatprep.subr.msk.mxu0 %vm4368_vm2, %v3887_v52  ;;  %7293 = vmatprep.subr.mxu1 %v3792_v53  ;;  %v3974_v52 = vrot.slane %v8998_v25, %v8990_v19 }
 0x24f   : > { %8170 = vmatpush1.msk.msra.mxu0 %vm4368_vm2, %v3886_v54  ;;  %7294 = vmatpush1.msra.mxu1 %v3791_v55  ;;  %v9030_v55 = vld [vmem:[#allocation8 + $0x10] sm:$0xff] }
 0x250   : > { %7506 = vmatprep.subr.mxu0 %v3798_v56  ;;  %7327 = vmatprep.mubr.f32.mxu1 %v8477_v8  ;;  %v4006_v14 = vrot.slane %v9030_v55, %v8990_v19 }
 0x251   : > { %8166 = vmatprep.subr.msk.mxu1 %vm4368_vm2, %v3885_v57  ;;  %7507 = vmatpush1.msra.mxu0 %v3797_v58 }
 0x252   : > { %7540 = vmatprep.mubr.f32.mxu0 %v8477_v8  ;;  %8162 = vmatmul.mubr.msk.f32.vlgmr.msra.gmra.mxu1 %vm4364_vm3, %v8763_v30 }
 0x253   : > { %8167 = vmatpush1.msk.msra.mxu1 %vm4368_vm2, %v3884_v59  ;;  %8171 = vmatmul.mubr.msk.f32.vlgmr.msra.gmra.mxu0 %vm4364_vm3, %v8763_v30 }
 0x254   : > { %8175 = vmatprep.subr.msk.mxu0 %vm4368_vm2, %v3891_v60  ;;  %7435 = vmatprep.subr.mxu1 %v3796_v61  ;;  %v3962_v60 = vrot.slane %v8998_v25, %v8994_v21 }
 0x255   : > { %8176 = vmatpush1.msk.msra.mxu0 %vm4368_vm2, %v3890_v62  ;;  %7436 = vmatpush1.msra.mxu1 %v3795_v63  ;;  %v3986_v62 = vrot.slane %v9030_v55, %v8984_v15  ;;  %v3966_v63 = vrot.slane %v8998_v25, %v9000_v26 }
 0x256   : > { %7648 = vmatprep.subr.mxu0 %v3802_v0  ;;  %7469 = vmatprep.mubr.f32.mxu1 %v8477_v8 }
 0x257   : > { %8172 = vmatprep.subr.msk.mxu1 %vm4368_vm2, %v3889_v1  ;;  %7649 = vmatpush1.msra.mxu0 %v3801_v2  ;;  %v3990_v1 = vrot.slane %v9030_v55, %v8988_v18 }
 0x258   : > { %7682 = vmatprep.mubr.f32.mxu0 %v8477_v8  ;;  %8168 = vmatmul.mubr.msk.f32.vlgmr.msra.gmra.mxu1 %vm4364_vm3, %v8763_v30 }
 0x259   : > { %8173 = vmatpush1.msk.msra.mxu1 %vm4368_vm2, %v3888_v3  ;;  %8177 = vmatmul.mubr.msk.f32.vlgmr.msra.gmra.mxu0 %vm4364_vm3, %v8763_v30 }
 0x25a   : > { %8199 = vmatprep.subr.mxu0 %v8477_v8  ;;  %7577 = vmatprep.subr.mxu1 %v3800_v4 }
 0x25b   : > { %8200 = vmatpush3.msk.msra.mxu0 %vm4368_vm2, %v3894_v5  ;;  %7578 = vmatpush1.msra.mxu1 %v3799_v6 }
 0x25c   : > { %8201 = vmatprep.subr.mxu0 %v8477_v8  ;;  %7611 = vmatprep.mubr.f32.mxu1 %v8477_v8 }
 0x25d   : > { %8178 = vmatprep.subr.msk.mxu1 %vm4368_vm2, %v3893_v7  ;;  %8202 = vmatpush3.msra.mxu0 %v3805_v9  ;;  %v3978_v9 = vrot.slane %v8998_v25, %v9012_v37 }
 0x25e   : > { %8203 = vmatprep.mubr.msk.f32.mxu0 %vm8478_vm1, %v8477_v8  ;;  %8174 = vmatmul.mubr.msk.f32.vlgmr.msra.gmra.mxu1 %vm4364_vm3, %v8763_v30 }
 0x25f   : > { %8179 = vmatpush1.msk.msra.mxu1 %vm4368_vm2, %v3892_v10  ;;  %8204 = vmatmul.mubr.msk.f32.vlgmr.msra.gmra.mxu0 %vm4364_vm3, %v8763_v30 }
 0x260   : > { %7719 = vmatprep.subr.mxu1 %v3804_v11  ;;  %7753 = vmatprep.mubr.f32.mxu1 %v8477_v8  ;;  %v3938_v8 = vrot.slane %v3895_v17, %v8986_v16  ;;  %v4002_v11 = vrot.slane %v9030_v55, %v8986_v16 }
 0x261   : > { %7720 = vmatpush1.msra.mxu1 %v3803_v12  ;;  %v3982_v12 = vrot.slane %v8998_v25, %v9018_v42  ;;  %v3994_v25 = vrot.slane %v9030_v55, %v8994_v21 }
 0x262   : > { %8180 = vmatmul.mubr.msk.f32.vlgmr.msra.gmra.mxu1 %vm4364_vm3, %v8763_v30  ;;  %v3926_v30 = vrot.slane %v3895_v17, %v8988_v18 }
 0x2a1   : > { %v4702_v23 = vpop.f32.mrf.mxu1  ;;  %v4844_v24 = vpop.f32.mrf.mxu0 }
 0x2a2   : > { %v4703_v27 = vadd.f32 %v4702_v23, %v3922_v20  ;;  %v4845_v28 = vadd.f32 %v4844_v24, %v3938_v8  ;;  %v9056_v8 = vld [vmem:[#allocation8 + $0x18] sm:$0xff] }
 0x2a3   : > { %v4704_v29 = vpop.f32.mrf.mxu1  ;;  %v4846_v31 = vpop.f32.mrf.mxu0 }
 0x2a4   : > { %7830 = vst [vmem:[%s9005_s12] sm:$0xff] %v4703_v27  ;;  %7834 = vst [vmem:[%s9005_s12 + $0x20] sm:$0xff] %v4845_v28  ;;  %v4705_v33 = vadd.f32 %v4704_v29, %v3926_v30  ;;  %v4847_v34 = vadd.f32 %v4846_v31, %v3942_v22  ;;  %v4018_v28 = vrot.slane %v9056_v8, %v8984_v15 }
 0x2a5   : > { %v3998_v29 = vrot.slane %v9030_v55, %v9000_v26 }
 0x2a6   : > { %7831 = vst [vmem:[%s9005_s12 + $0x8] sm:$0xff] %v4705_v33  ;;  %7835 = vst [vmem:[%s9005_s12 + $0x28] sm:$0xff] %v4847_v34  ;;  %v4773_v38 = vpop.f32.mrf.mxu1 }
 0x2a7   : > { %v4774_v40 = vadd.f32 %v4773_v38, %v3930_v32  ;;  %v4986_v41 = vpop.f32.mrf.mxu0  ;;  %v4022_v32 = vrot.slane %v9056_v8, %v8988_v18 }
 0x2a8   : > { %v4987_v43 = vadd.f32 %v4986_v41, %v3954_v35  ;;  %v4775_v44 = vpop.f32.mrf.mxu1 }
 0x2a9   : > { %7832 = vst [vmem:[%s9005_s12 + $0x10] sm:$0xff] %v4774_v40  ;;  %v4776_v45 = vadd.f32 %v4775_v44, %v3934_v36  ;;  %v4988_v46 = vpop.f32.mrf.mxu0  ;;  %v4010_v40 = vrot.slane %v9030_v55, %v9012_v37  ;;  %v4014_v44 = vrot.slane %v9030_v55, %v9018_v42 }
 0x2aa   : > { %7838 = vst [vmem:[%s9005_s12 + $0x40] sm:$0xff] %v4987_v43  ;;  %v4989_v48 = vadd.f32 %v4988_v46, %v3958_v39  ;;  %v4034_v43 = vrot.slane %v9056_v8, %v8986_v16  ;;  %v4038_v46 = vrot.slane %v9056_v8, %v8990_v19 }
 0x2ab   : > { %7833 = vst [vmem:[%s9005_s12 + $0x18] sm:$0xff] %v4776_v45 }
 0x2ac   : > { %7839 = vst [vmem:[%s9005_s12 + $0x48] sm:$0xff] %v4989_v48  ;;  %v4915_v51 = vpop.f32.mrf.mxu1 }
 0x2ad   : > { %v4916_v53 = vadd.f32 %v4915_v51, %v3946_v47  ;;  %v5128_v54 = vpop.f32.mrf.mxu0 }
 0x2ae   : > { %v5129_v56 = vadd.f32 %v5128_v54, %v3970_v49  ;;  %v4917_v57 = vpop.f32.mrf.mxu1  ;;  %v9082_v49 = vld [vmem:[#allocation8 + $0x20] sm:$0xff]  ;;  %v4026_v54 = vrot.slane %v9056_v8, %v8994_v21 }
 0x2af   : > { %7836 = vst [vmem:[%s9005_s12 + $0x30] sm:$0xff] %v4916_v53  ;;  %v4918_v58 = vadd.f32 %v4917_v57, %v3950_v50  ;;  %v5130_v59 = vpop.f32.mrf.mxu0  ;;  %v4030_v57 = vrot.slane %v9056_v8, %v9000_v26 }
 0x2b0   : > { %7842 = vst [vmem:[%s9005_s12 + $0x60] sm:$0xff] %v5129_v56  ;;  %v5131_v61 = vadd.f32 %v5130_v59, %v3974_v52  ;;  %v4050_v56 = vrot.slane %v9082_v49, %v8984_v15  ;;  %v4054_v59 = vrot.slane %v9082_v49, %v8988_v18 }
 0x2b1   : > { %7837 = vst [vmem:[%s9005_s12 + $0x38] sm:$0xff] %v4918_v58 }
 0x2b2   : > { %7843 = vst [vmem:[%s9005_s12 + $0x68] sm:$0xff] %v5131_v61  ;;  %v5057_v0 = vpop.f32.mrf.mxu1 }
 0x2b3   : > { %v5058_v2 = vadd.f32 %v5057_v0, %v3962_v60  ;;  %v5270_v3 = vpop.f32.mrf.mxu0 }
 0x2b4   : > { %v5271_v4 = vadd.f32 %v5270_v3, %v3986_v62  ;;  %v5059_v5 = vpop.f32.mrf.mxu1 }
 0x2b5   : > { %7840 = vst [vmem:[%s9005_s12 + $0x50] sm:$0xff] %v5058_v2  ;;  %v5060_v6 = vadd.f32 %v5059_v5, %v3966_v63  ;;  %v5272_v7 = vpop.f32.mrf.mxu0  ;;  %v4042_v2 = vrot.slane %v9056_v8, %v9012_v37  ;;  %v4046_v5 = vrot.slane %v9056_v8, %v9018_v42 }
 0x2b6   : > { %7846 = vst [vmem:[%s9005_s12 + $0x80] sm:$0xff] %v5271_v4  ;;  %v5273_v10 = vadd.f32 %v5272_v7, %v3990_v1  ;;  %v4066_v4 = vrot.slane %v9082_v49, %v8986_v16  ;;  %v4070_v7 = vrot.slane %v9082_v49, %v8990_v19 }
 0x2b7   : > { %7841 = vst [vmem:[%s9005_s12 + $0x58] sm:$0xff] %v5060_v6 }
 0x2b8   : > { %7847 = vst [vmem:[%s9005_s12 + $0x88] sm:$0xff] %v5273_v10  ;;  %v5199_v13 = vpop.f32.mrf.mxu1 }
 0x2b9   : > { %v5200_v17 = vadd.f32 %v5199_v13, %v3978_v9  ;;  %v5412_v20 = vpop.f32.mrf.mxu0 }
 0x2ba   : > { %v5413_v30 = vadd.f32 %v5412_v20, %v4002_v11  ;;  %v5201_v22 = vpop.f32.mrf.mxu1  ;;  %v9108_v11 = vld [vmem:[#allocation8 + $0x28] sm:$0xff]  ;;  %v4058_v20 = vrot.slane %v9082_v49, %v8994_v21 }
 0x2bb   : > { %7844 = vst [vmem:[%s9005_s12 + $0x70] sm:$0xff] %v5200_v17  ;;  %v5202_v23 = vadd.f32 %v5201_v22, %v3982_v12  ;;  %v5414_v24 = vpop.f32.mrf.mxu0  ;;  %v4062_v22 = vrot.slane %v9082_v49, %v9000_v26 }
 0x2bc   : > { %7850 = vst [vmem:[%s9005_s12 + $0xa0] sm:$0xff] %v5413_v30  ;;  %v5415_v27 = vadd.f32 %v5414_v24, %v4006_v14  ;;  %v4082_v30 = vrot.slane %v9108_v11, %v8984_v15  ;;  %v4086_v24 = vrot.slane %v9108_v11, %v8988_v18 }
 0x2bd   : > { %7845 = vst [vmem:[%s9005_s12 + $0x78] sm:$0xff] %v5202_v23 }
 0x2be   : > { %7851 = vst [vmem:[%s9005_s12 + $0xa8] sm:$0xff] %v5415_v27  ;;  %v5341_v31 = vpop.f32.mrf.mxu1 }
 0x2bf   : > { %v5342_v33 = vadd.f32 %v5341_v31, %v3994_v25  ;;  %v5554_v34 = vpop.f32.mrf.mxu0 }
 0x2c0   : > { %v5555_v35 = vadd.f32 %v5554_v34, %v4018_v28  ;;  %v5343_v36 = vpop.f32.mrf.mxu1 }
 0x2c1   : > { %7848 = vst [vmem:[%s9005_s12 + $0x90] sm:$0xff] %v5342_v33  ;;  %v5344_v38 = vadd.f32 %v5343_v36, %v3998_v29  ;;  %v5556_v39 = vpop.f32.mrf.mxu0  ;;  %v4074_v33 = vrot.slane %v9082_v49, %v9012_v37  ;;  %v4078_v36 = vrot.slane %v9082_v49, %v9018_v42 }
 0x2c2   : > { %7854 = vst [vmem:[%s9005_s12 + $0xc0] sm:$0xff] %v5555_v35  ;;  %v5557_v41 = vadd.f32 %v5556_v39, %v4022_v32  ;;  %v4098_v35 = vrot.slane %v9108_v11, %v8986_v16  ;;  %v4102_v39 = vrot.slane %v9108_v11, %v8990_v19 }
 0x2c3   : > { %7849 = vst [vmem:[%s9005_s12 + $0x98] sm:$0xff] %v5344_v38 }
 0x2c4   : > { %7855 = vst [vmem:[%s9005_s12 + $0xc8] sm:$0xff] %v5557_v41  ;;  %v5483_v45 = vpop.f32.mrf.mxu1 }
 0x2c5   : > { %v5484_v47 = vadd.f32 %v5483_v45, %v4010_v40  ;;  %v5696_v48 = vpop.f32.mrf.mxu0 }
 0x2c6   : > { %v5697_v50 = vadd.f32 %v5696_v48, %v4034_v43  ;;  %v5485_v51 = vpop.f32.mrf.mxu1  ;;  %v9134_v43 = vld [vmem:[#allocation8 + $0x30] sm:$0xff]  ;;  %v4090_v48 = vrot.slane %v9108_v11, %v8994_v21 }
 0x2c7   : > { %7852 = vst [vmem:[%s9005_s12 + $0xb0] sm:$0xff] %v5484_v47  ;;  %v5486_v52 = vadd.f32 %v5485_v51, %v4014_v44  ;;  %v5698_v53 = vpop.f32.mrf.mxu0  ;;  %v4094_v51 = vrot.slane %v9108_v11, %v9000_v26 }
 0x2c8   : > { %7858 = vst [vmem:[%s9005_s12 + $0xe0] sm:$0xff] %v5697_v50  ;;  %v5699_v55 = vadd.f32 %v5698_v53, %v4038_v46  ;;  %v4114_v50 = vrot.slane %v9134_v43, %v8984_v15  ;;  %v4118_v53 = vrot.slane %v9134_v43, %v8988_v18 }
 0x2c9   : > { %7853 = vst [vmem:[%s9005_s12 + $0xb8] sm:$0xff] %v5486_v52 }
 0x2ca   : > { %7859 = vst [vmem:[%s9005_s12 + $0xe8] sm:$0xff] %v5699_v55  ;;  %v5625_v58 = vpop.f32.mrf.mxu1 }
 0x2cb   : > { %v5626_v60 = vadd.f32 %v5625_v58, %v4026_v54  ;;  %v5838_v61 = vpop.f32.mrf.mxu0 }
 0x2cc   : > { %v5839_v62 = vadd.f32 %v5838_v61, %v4050_v56  ;;  %v5627_v63 = vpop.f32.mrf.mxu1 }
 0x2cd   : > { %7856 = vst [vmem:[%s9005_s12 + $0xd0] sm:$0xff] %v5626_v60  ;;  %v5628_v0 = vadd.f32 %v5627_v63, %v4030_v57  ;;  %v5840_v1 = vpop.f32.mrf.mxu0  ;;  %v4106_v60 = vrot.slane %v9108_v11, %v9012_v37  ;;  %v4110_v63 = vrot.slane %v9108_v11, %v9018_v42 }
 0x2ce   : > { %7862 = vst [vmem:[%s9005_s12 + $0x100] sm:$0xff] %v5839_v62  ;;  %v5841_v3 = vadd.f32 %v5840_v1, %v4054_v59  ;;  %v4130_v62 = vrot.slane %v9134_v43, %v8986_v16  ;;  %v4134_v1 = vrot.slane %v9134_v43, %v8990_v19 }
 0x2cf   : > { %7857 = vst [vmem:[%s9005_s12 + $0xd8] sm:$0xff] %v5628_v0 }
 0x2d0   : > { %7863 = vst [vmem:[%s9005_s12 + $0x108] sm:$0xff] %v5841_v3  ;;  %v5767_v6 = vpop.f32.mrf.mxu1 }
 0x2d1   : > { %v5768_v9 = vadd.f32 %v5767_v6, %v4042_v2  ;;  %v5980_v10 = vpop.f32.mrf.mxu0 }
 0x2d2   : > { %v5981_v12 = vadd.f32 %v5980_v10, %v4066_v4  ;;  %v5769_v13 = vpop.f32.mrf.mxu1  ;;  %v9160_v4 = vld [vmem:[#allocation8 + $0x38] sm:$0xff]  ;;  %v4122_v10 = vrot.slane %v9134_v43, %v8994_v21 }
 0x2d3   : > { %7860 = vst [vmem:[%s9005_s12 + $0xf0] sm:$0xff] %v5768_v9  ;;  %v5770_v14 = vadd.f32 %v5769_v13, %v4046_v5  ;;  %v5982_v17 = vpop.f32.mrf.mxu0  ;;  %v4126_v13 = vrot.slane %v9134_v43, %v9000_v26 }
 0x2d4   : > { %7866 = vst [vmem:[%s9005_s12 + $0x120] sm:$0xff] %v5981_v12  ;;  %v5983_v8 = vadd.f32 %v5982_v17, %v4070_v7  ;;  %v4146_v12 = vrot.slane %v9160_v4, %v8984_v15  ;;  %v4150_v17 = vrot.slane %v9160_v4, %v8988_v18 }
 0x2d5   : > { %7861 = vst [vmem:[%s9005_s12 + $0xf8] sm:$0xff] %v5770_v14 }
 0x2d6   : > { %7867 = vst [vmem:[%s9005_s12 + $0x128] sm:$0xff] %v5983_v8  ;;  %v5909_v23 = vpop.f32.mrf.mxu1 }
 0x2d7   : > { %v5910_v25 = vadd.f32 %v5909_v23, %v4058_v20  ;;  %v6122_v27 = vpop.f32.mrf.mxu0 }
 0x2d8   : > { %v6123_v28 = vadd.f32 %v6122_v27, %v4082_v30  ;;  %v5911_v29 = vpop.f32.mrf.mxu1 }
 0x2d9   : > { %7864 = vst [vmem:[%s9005_s12 + $0x110] sm:$0xff] %v5910_v25  ;;  %v5912_v31 = vadd.f32 %v5911_v29, %v4062_v22  ;;  %v6124_v32 = vpop.f32.mrf.mxu0  ;;  %v4138_v25 = vrot.slane %v9134_v43, %v9012_v37  ;;  %v4142_v29 = vrot.slane %v9134_v43, %v9018_v42 }
 0x2da   : > { %7870 = vst [vmem:[%s9005_s12 + $0x140] sm:$0xff] %v6123_v28  ;;  %v6125_v34 = vadd.f32 %v6124_v32, %v4086_v24  ;;  %v4162_v28 = vrot.slane %v9160_v4, %v8986_v16  ;;  %v4166_v32 = vrot.slane %v9160_v4, %v8990_v19 }
 0x2db   : > { %7865 = vst [vmem:[%s9005_s12 + $0x118] sm:$0xff] %v5912_v31 }
 0x2dc   : > { %7871 = vst [vmem:[%s9005_s12 + $0x148] sm:$0xff] %v6125_v34  ;;  %v6051_v38 = vpop.f32.mrf.mxu1 }
 0x2dd   : > { %v6052_v40 = vadd.f32 %v6051_v38, %v4074_v33  ;;  %v6264_v41 = vpop.f32.mrf.mxu0 }
 0x2de   : > { %v6265_v44 = vadd.f32 %v6264_v41, %v4098_v35  ;;  %v6053_v45 = vpop.f32.mrf.mxu1  ;;  %v9186_v35 = vld [vmem:[#allocation8 + $0x40] sm:$0xff]  ;;  %v4154_v41 = vrot.slane %v9160_v4, %v8994_v21 }
 0x2df   : > { %7868 = vst [vmem:[%s9005_s12 + $0x130] sm:$0xff] %v6052_v40  ;;  %v6054_v46 = vadd.f32 %v6053_v45, %v4078_v36  ;;  %v6266_v47 = vpop.f32.mrf.mxu0  ;;  %v4158_v45 = vrot.slane %v9160_v4, %v9000_v26 }
 0x2e0   : > { %7874 = vst [vmem:[%s9005_s12 + $0x160] sm:$0xff] %v6265_v44  ;;  %v6267_v49 = vadd.f32 %v6266_v47, %v4102_v39  ;;  %v4178_v44 = vrot.slane %v9186_v35, %v8984_v15  ;;  %v4182_v47 = vrot.slane %v9186_v35, %v8988_v18 }
 0x2e1   : > { %7869 = vst [vmem:[%s9005_s12 + $0x138] sm:$0xff] %v6054_v46 }
 0x2e2   : > { %7875 = vst [vmem:[%s9005_s12 + $0x168] sm:$0xff] %v6267_v49  ;;  %v6193_v52 = vpop.f32.mrf.mxu1 }
 0x2e3   : > { %v6194_v54 = vadd.f32 %v6193_v52, %v4090_v48  ;;  %v6406_v55 = vpop.f32.mrf.mxu0 }
 0x2e4   : > { %v6407_v56 = vadd.f32 %v6406_v55, %v4114_v50  ;;  %v6195_v57 = vpop.f32.mrf.mxu1 }
 0x2e5   : > { %7872 = vst [vmem:[%s9005_s12 + $0x150] sm:$0xff] %v6194_v54  ;;  %v6196_v58 = vadd.f32 %v6195_v57, %v4094_v51  ;;  %v6408_v59 = vpop.f32.mrf.mxu0  ;;  %v4170_v54 = vrot.slane %v9160_v4, %v9012_v37  ;;  %v4174_v57 = vrot.slane %v9160_v4, %v9018_v42 }
 0x2e6   : > { %7878 = vst [vmem:[%s9005_s12 + $0x180] sm:$0xff] %v6407_v56  ;;  %v6409_v61 = vadd.f32 %v6408_v59, %v4118_v53  ;;  %v4194_v56 = vrot.slane %v9186_v35, %v8986_v16  ;;  %v4198_v59 = vrot.slane %v9186_v35, %v8990_v19 }
 0x2e7   : > { %7873 = vst [vmem:[%s9005_s12 + $0x158] sm:$0xff] %v6196_v58 }
 0x2e8   : > { %7879 = vst [vmem:[%s9005_s12 + $0x188] sm:$0xff] %v6409_v61  ;;  %v6335_v0 = vpop.f32.mrf.mxu1 }
 0x2e9   : > { %v6336_v2 = vadd.f32 %v6335_v0, %v4106_v60  ;;  %v6548_v3 = vpop.f32.mrf.mxu0 }
 0x2ea   : > { %v6549_v5 = vadd.f32 %v6548_v3, %v4130_v62  ;;  %v6337_v6 = vpop.f32.mrf.mxu1  ;;  %v9212_v62 = vld [vmem:[#allocation8 + $0x48] sm:$0xff]  ;;  %v4186_v3 = vrot.slane %v9186_v35, %v8994_v21 }
 0x2eb   : > { %7876 = vst [vmem:[%s9005_s12 + $0x170] sm:$0xff] %v6336_v2  ;;  %v6338_v7 = vadd.f32 %v6337_v6, %v4110_v63  ;;  %v6550_v9 = vpop.f32.mrf.mxu0  ;;  %v4190_v6 = vrot.slane %v9186_v35, %v9000_v26 }
 0x2ec   : > { %7882 = vst [vmem:[%s9005_s12 + $0x1a0] sm:$0xff] %v6549_v5  ;;  %v6551_v11 = vadd.f32 %v6550_v9, %v4134_v1  ;;  %v4210_v5 = vrot.slane %v9212_v62, %v8984_v15  ;;  %v4214_v9 = vrot.slane %v9212_v62, %v8988_v18 }
 0x2ed   : > { %7877 = vst [vmem:[%s9005_s12 + $0x178] sm:$0xff] %v6338_v7 }
 0x2ee   : > { %7883 = vst [vmem:[%s9005_s12 + $0x1a8] sm:$0xff] %v6551_v11  ;;  %v6477_v14 = vpop.f32.mrf.mxu1 }
 0x2ef   : > { %v6478_v20 = vadd.f32 %v6477_v14, %v4122_v10  ;;  %v6690_v8 = vpop.f32.mrf.mxu0 }
 0x2f0   : > { %v6691_v30 = vadd.f32 %v6690_v8, %v4146_v12  ;;  %v6479_v22 = vpop.f32.mrf.mxu1 }
 0x2f1   : > { %7880 = vst [vmem:[%s9005_s12 + $0x190] sm:$0xff] %v6478_v20  ;;  %v6480_v23 = vadd.f32 %v6479_v22, %v4126_v13  ;;  %v6692_v24 = vpop.f32.mrf.mxu0  ;;  %v4202_v20 = vrot.slane %v9186_v35, %v9012_v37  ;;  %v4206_v22 = vrot.slane %v9186_v35, %v9018_v42 }
 0x2f2   : > { %7886 = vst [vmem:[%s9005_s12 + $0x1c0] sm:$0xff] %v6691_v30  ;;  %v6693_v27 = vadd.f32 %v6692_v24, %v4150_v17  ;;  %v4226_v30 = vrot.slane %v9212_v62, %v8986_v16  ;;  %v4230_v24 = vrot.slane %v9212_v62, %v8990_v19 }
 0x2f3   : > { %7881 = vst [vmem:[%s9005_s12 + $0x198] sm:$0xff] %v6480_v23 }
 0x2f4   : > { %7887 = vst [vmem:[%s9005_s12 + $0x1c8] sm:$0xff] %v6693_v27  ;;  %v6619_v31 = vpop.f32.mrf.mxu1 }
 0x2f5   : > { %v6620_v33 = vadd.f32 %v6619_v31, %v4138_v25  ;;  %v6832_v34 = vpop.f32.mrf.mxu0 }
 0x2f6   : > { %v6833_v36 = vadd.f32 %v6832_v34, %v4162_v28  ;;  %v6621_v38 = vpop.f32.mrf.mxu1  ;;  %v9238_v28 = vld [vmem:[#allocation8 + $0x50] sm:$0xff]  ;;  %v4218_v34 = vrot.slane %v9212_v62, %v8994_v21 }
 0x2f7   : > { %7884 = vst [vmem:[%s9005_s12 + $0x1b0] sm:$0xff] %v6620_v33  ;;  %v6622_v39 = vadd.f32 %v6621_v38, %v4142_v29  ;;  %v6834_v40 = vpop.f32.mrf.mxu0  ;;  %v4222_v38 = vrot.slane %v9212_v62, %v9000_v26 }
 0x2f8   : > { %7890 = vst [vmem:[%s9005_s12 + $0x1e0] sm:$0xff] %v6833_v36  ;;  %v6835_v43 = vadd.f32 %v6834_v40, %v4166_v32  ;;  %v4242_v36 = vrot.slane %v9238_v28, %v8984_v15  ;;  %v4246_v40 = vrot.slane %v9238_v28, %v8988_v18  ;;  %v4234_v15 = vrot.slane %v9212_v62, %v9012_v37 }
 0x2f9   : > { %7885 = vst [vmem:[%s9005_s12 + $0x1b8] sm:$0xff] %v6622_v39  ;;  %v4238_v18 = vrot.slane %v9212_v62, %v9018_v42 }
 0x2fa   : > { %7891 = vst [vmem:[%s9005_s12 + $0x1e8] sm:$0xff] %v6835_v43  ;;  %v6761_v46 = vpop.f32.mrf.mxu1 }
 0x2fb   : > { %v6762_v48 = vadd.f32 %v6761_v46, %v4154_v41  ;;  %v6974_v49 = vpop.f32.mrf.mxu0 }
 0x2fc   : > { %v6975_v50 = vadd.f32 %v6974_v49, %v4178_v44  ;;  %v6763_v51 = vpop.f32.mrf.mxu1  ;;  %v4258_v49 = vrot.slane %v9238_v28, %v8986_v16  ;;  %v4250_v16 = vrot.slane %v9238_v28, %v8994_v21 }
 0x2fd   : > { %7888 = vst [vmem:[%s9005_s12 + $0x1d0] sm:$0xff] %v6762_v48  ;;  %v6764_v52 = vadd.f32 %v6763_v51, %v4158_v45  ;;  %v6976_v53 = vpop.f32.mrf.mxu0  ;;  %v4262_v51 = vrot.slane %v9238_v28, %v8990_v19  ;;  %v4254_v19 = vrot.slane %v9238_v28, %v9000_v26 }
 0x2fe   : > { %7894 = vst [vmem:[%s9005_s12 + $0x200] sm:$0xff] %v6975_v50  ;;  %v6977_v55 = vadd.f32 %v6976_v53, %v4182_v47 }
 0x2ff   : > { %7889 = vst [vmem:[%s9005_s12 + $0x1d8] sm:$0xff] %v6764_v52 }
 0x300   : > { %7895 = vst [vmem:[%s9005_s12 + $0x208] sm:$0xff] %v6977_v55  ;;  %v6903_v58 = vpop.f32.mrf.mxu1 }
 0x301   : > { %v6904_v60 = vadd.f32 %v6903_v58, %v4170_v54  ;;  %v7116_v61 = vpop.f32.mrf.mxu0 }
 0x302   : > { %v7117_v63 = vadd.f32 %v7116_v61, %v4194_v56  ;;  %v6905_v0 = vpop.f32.mrf.mxu1 }
 0x303   : > { %7892 = vst [vmem:[%s9005_s12 + $0x1f0] sm:$0xff] %v6904_v60  ;;  %v6906_v1 = vadd.f32 %v6905_v0, %v4174_v57  ;;  %v7118_v2 = vpop.f32.mrf.mxu0 }
 0x304   : > { %7898 = vst [vmem:[%s9005_s12 + $0x220] sm:$0xff] %v7117_v63  ;;  %v7119_v4 = vadd.f32 %v7118_v2, %v4198_v59  ;;  %v8048_v59 = vld [vmem:[#allocation8 + $0x58] ss:$0 sm:$0xff]  ;;  %v4266_v63 = vrot.slane %v9238_v28, %v9012_v37 }
 0x305   : > { %7893 = vst [vmem:[%s9005_s12 + $0x1f8] sm:$0xff] %v6906_v1 }
 0x306   : > { %7899 = vst [vmem:[%s9005_s12 + $0x228] sm:$0xff] %v7119_v4  ;;  %v7045_v7 = vpop.f32.mrf.mxu1 }
 0x307   : > { %v7046_v10 = vadd.f32 %v7045_v7, %v4186_v3  ;;  %v7258_v11 = vpop.f32.mrf.mxu0  ;;  %v4270_v3 = vrot.slane %v9238_v28, %v9018_v42 }
 0x308   : > { %v7259_v12 = vadd.f32 %v7258_v11, %v4210_v5  ;;  %v7047_v13 = vpop.f32.mrf.mxu1 }
 0x309   : > { %7896 = vst [vmem:[%s9005_s12 + $0x210] sm:$0xff] %v7046_v10  ;;  %v7048_v14 = vadd.f32 %v7047_v13, %v4190_v6  ;;  %v7260_v17 = vpop.f32.mrf.mxu0 }
 0x30a   : > { %7902 = vst [vmem:[%s9005_s12 + $0x240] sm:$0xff] %v7259_v12  ;;  %v7261_v8 = vadd.f32 %v7260_v17, %v4214_v9 }
 0x30b   : > { %7897 = vst [vmem:[%s9005_s12 + $0x218] sm:$0xff] %v7048_v14 }
 0x30c   : > { %7903 = vst [vmem:[%s9005_s12 + $0x248] sm:$0xff] %v7261_v8  ;;  %v7187_v23 = vpop.f32.mrf.mxu1 }
 0x30d   : > { %v7188_v25 = vadd.f32 %v7187_v23, %v4202_v20  ;;  %v7400_v27 = vpop.f32.mrf.mxu0 }
 0x30e   : > { %v7401_v29 = vadd.f32 %v7400_v27, %v4226_v30  ;;  %v7189_v31 = vpop.f32.mrf.mxu1 }
 0x30f   : > { %7900 = vst [vmem:[%s9005_s12 + $0x230] sm:$0xff] %v7188_v25  ;;  %v7190_v32 = vadd.f32 %v7189_v31, %v4206_v22  ;;  %v7402_v33 = vpop.f32.mrf.mxu0 }
 0x310   : > { %7906 = vst [vmem:[%s9005_s12 + $0x260] sm:$0xff] %v7401_v29  ;;  %v7403_v35 = vadd.f32 %v7402_v33, %v4230_v24 }
 0x311   : > { %7901 = vst [vmem:[%s9005_s12 + $0x238] sm:$0xff] %v7190_v32 }
 0x312   : > { %7907 = vst [vmem:[%s9005_s12 + $0x268] sm:$0xff] %v7403_v35  ;;  %v7329_v39 = vpop.f32.mrf.mxu1 }
 0x313   : > { %v7330_v41 = vadd.f32 %v7329_v39, %v4218_v34  ;;  %v7542_v43 = vpop.f32.mrf.mxu0 }
 0x314   : > { %v7543_v44 = vadd.f32 %v7542_v43, %v4242_v36  ;;  %v7331_v45 = vpop.f32.mrf.mxu1 }
 0x315   : > { %7904 = vst [vmem:[%s9005_s12 + $0x250] sm:$0xff] %v7330_v41  ;;  %v7332_v46 = vadd.f32 %v7331_v45, %v4222_v38  ;;  %v7544_v47 = vpop.f32.mrf.mxu0 }
 0x316   : > { %7910 = vst [vmem:[%s9005_s12 + $0x280] sm:$0xff] %v7543_v44  ;;  %v7545_v48 = vadd.f32 %v7544_v47, %v4246_v40 }
 0x317   : > { %7905 = vst [vmem:[%s9005_s12 + $0x258] sm:$0xff] %v7332_v46 }
 0x318   : > { %7911 = vst [vmem:[%s9005_s12 + $0x288] sm:$0xff] %v7545_v48  ;;  %v7471_v50 = vpop.f32.mrf.mxu1 }
 0x319   : > { %v7472_v52 = vadd.f32 %v7471_v50, %v4234_v15  ;;  %v7684_v53 = vpop.f32.mrf.mxu0 }
 0x31a   : > { %v7685_v54 = vadd.f32 %v7684_v53, %v4258_v49  ;;  %v7473_v55 = vpop.f32.mrf.mxu1 }
 0x31b   : > { %7908 = vst [vmem:[%s9005_s12 + $0x270] sm:$0xff] %v7472_v52  ;;  %v7474_v56 = vadd.f32 %v7473_v55, %v4238_v18  ;;  %v7686_v57 = vpop.f32.mrf.mxu0 }
 0x31c   : > { %7914 = vst [vmem:[%s9005_s12 + $0x2a0] sm:$0xff] %v7685_v54  ;;  %v7687_v58 = vadd.f32 %v7686_v57, %v4262_v51 }
 0x31d   : > { %7909 = vst [vmem:[%s9005_s12 + $0x278] sm:$0xff] %v7474_v56 }
 0x31e   : > { %7915 = vst [vmem:[%s9005_s12 + $0x2a8] sm:$0xff] %v7687_v58  ;;  %v7613_v60 = vpop.f32.mrf.mxu1 }
 0x31f   : > { %v7614_v61 = vadd.f32 %v7613_v60, %v4250_v16  ;;  %v7826_v62 = vpop.f32.mrf.mxu0 }
 0x320   : > { %v7827_v21 = vadd.f32 %v8048_v59, %v7826_v62  ;;  %v7615_v0 = vpop.f32.mrf.mxu1 }
 0x321   : > { %7912 = vst [vmem:[%s9005_s12 + $0x290] sm:$0xff] %v7614_v61  ;;  %v7616_v1 = vadd.f32 %v7615_v0, %v4254_v19  ;;  %v8205_v2 = vpop.f32.mrf.mxu0 }
 0x322   : > { %7918 = vst.msk [vmem:[%s9005_s12 + $0x2c0] sm:$0xff] %vm557_vm0, %v7827_v21  ;;  %v7755_v26 = vpop.f32.mrf.mxu1 }
 0x323   : > { %7913 = vst [vmem:[%s9005_s12 + $0x298] sm:$0xff] %v7616_v1  ;;  %v7756_v4 = vadd.f32 %v7755_v26, %v4266_v63 }
 0x324   : > { %v7757_v5 = vpop.f32.mrf.mxu1 }
 0x325   : > { %7916 = vst [vmem:[%s9005_s12 + $0x2b0] sm:$0xff] %v7756_v4  ;;  %v7758_v37 = vadd.f32 %v7757_v5, %v4270_v3 }
 0x327   : > { %7917 = vst [vmem:[%s9005_s12 + $0x2b8] sm:$0xff] %v7758_v37 }
 0x328   : > { %8410 = shalt.err (!%p8407_p2)
}
 0x329   : > { %s8411_s28 = scalar_lea.hbm %s7932_s11, 11392  ;;  %s8415_s29 = scalar_lea.hbm %s9323_s5, 22784 }
 0x32a   : > { %p8412_p6 = scmp.ne.s32.totalorder %s7932_s11, %s8411_s28  ;;  %p8416_p1 = scmp.lt.s32.totalorder %s7932_s11, %s9323_s5 }
 0x32b   : > { %p8417_p11 = scmp.lt.s32.totalorder %s8415_s29, %s8411_s28 }
 0x32c   : > { %p8413_p4 = pnand %p8412_p6, %p9341_p0 }
 0x32d   : > { %p8418_p13 = por %p8417_p11, %p8416_p1 }
 0x32e   : > { %p8414_p8 = pneg %p8413_p4 }
 0x330   : > { %p8419_p12 = pnand %p8418_p13, %p8414_p8 }
 0x332   : > { %8422 = shalt.err (!%p8419_p12)
}
 0x333   : > { %8224 = dma.vmem_to_hbm [thread:$0]  (%p9341_p0), %s7935_s17, 11392, %s7932_s11, %s7920_s8  }
 0x334 PF: > { %s7946_s12 = sand.u32 1, %s8457_s18   ;;  %p9342_p5 = scmp.ne.s32.totalorder %s9329_s25, 0 }
 0x335   : > { %p9343_p3 = scmp.ge.s32.totalorder %s8469_s21, 2  ;;  %s7947_s15 = scalar_lea.sflag [#allocation4], %s7946_s12 }
 0x337   : > { %p8241_p10 = pnand %p9343_p3, %p9342_p5 }
 0x339   : > { %p8242_p7 = pneg %p8241_p10 }
 0x33b   : > { %8452 = dma.done.wait (%p8242_p7), %s7947_s15, 11392  }
 0x33c   : > { %8454 = vsyncadd (%p8242_p7), %s7947_s15, 4294955904  ;;  %p20_p9 = scmp.ge.s32.totalorder %s8590_s30, 4   ;;  %s9344_s18 = smov %s8461_s19 }
 0x33d   : > { %s9345_s19 = smov %s8465_s20  ;;  %s9346_s20 = smov %s8600_s7 }
 0x33e   : > { %s9347_s21 = smov %s8590_s30  ;;  %22 = sbr.rel (!%p20_p9) target bundleno = 7 (0x7), region = 97 }
 0x343   :  { %7952 = vsyncpa [#allocation3], 1 }
 0x344   :  { %7954 = vsyncpa [#allocation3 + $0x1], 1 }
 0x345   :  { %7955 = vsyncpa [#allocation6], 1 }
 0x346   :  { %7956 = vsyncpa [#allocation9], 1 }
 0x347   :  { %7957 = vsyncpa [#allocation4], 1 }
 0x348   :  { %7959 = vsyncpa [#allocation4 + $0x1], 1 }

</bundles_post_ra>
